<compile_context>
chip_gen: v7x
topology: tpu7x:2x2x1
jax: 0.10.0
libtpu: 0.0.40
codegen_flags: <defaults>
</compile_context>

<pallas_src>
import functools

import numpy as np
import jax
import jax.numpy as jnp
from jax.experimental import pallas as pl
from jax.experimental.pallas import tpu as pltpu


# ------------------------- interpolation weights -------------------------

def _linear_interp_matrix(out_size: int, in_size: int) -> np.ndarray:
    """Weights matching PyTorch F.interpolate(mode='trilinear', align_corners=False), per axis."""
    scale = in_size / out_size
    dst = np.arange(out_size, dtype=np.float64)
    src = scale * (dst + 0.5) - 0.5
    src = np.maximum(src, 0.0)                                  # PyTorch clamps negatives to 0
    i0 = np.minimum(np.floor(src).astype(np.int64), in_size - 1)
    i1 = np.minimum(i0 + 1, in_size - 1)
    lam = np.clip(src - i0, 0.0, 1.0)
    m = np.zeros((out_size, in_size), dtype=np.float32)
    m[np.arange(out_size), i0] += (1.0 - lam).astype(np.float32)
    m[np.arange(out_size), i1] += lam.astype(np.float32)
    return m


@functools.lru_cache(maxsize=None)
def _interp_weights_np(D, d, H, h, W, w):
    """Cached per-axis interpolation matrices.

    IMPORTANT: returns numpy arrays only.  Caching jnp arrays created while tracing a jitted
    function leaks tracers across traces (the bug in the previous version)."""
    return (_linear_interp_matrix(D, d),
            _linear_interp_matrix(H, h),
            _linear_interp_matrix(W, w))


# ---------------------------- Pallas kernels ----------------------------

def _tre_loss_kernel(gt_ref, pre_ref, wd_ref, mask_ref, num_ref, den_ref, *, num_channels):
    """Per-tile partial sums.  No scalar accumulator, no init/finalize -> 'parallel' grid axis."""
    wd = wd_ref[...]                                            # [D, d]
    ss = None
    for c in range(num_channels):                               # unrolled channel loop (C small)
        # D-axis trilinear pass, fused here: [D, d] @ [d, tn] -> [D, tn] (f32 accumulation)
        up_c = jnp.dot(wd, pre_ref[c], preferred_element_type=jnp.float32)
        diff = gt_ref[c].astype(jnp.float32) - up_c
        sq = diff * diff
        ss = sq if ss is None else ss + sq

    m = mask_ref[...].astype(jnp.float32)                       # [D, tn]
    l1 = jnp.sqrt(ss) * m
    # Sublane-only reduce per step; the cross-lane reduce + divide happen once in XLA.
    num_ref[...] = jnp.sum(l1, axis=0)[None, None, :]           # (1, 1, tn)
    den_ref[...] = jnp.sum(m, axis=0)[None, None, :]            # (1, 1, tn)


def _tre_part_kernel(gt_ref, pre_ref, wd_ref, mask_ref, out_ref, *, num_channels):
    wd = wd_ref[...]
    ss = None
    for c in range(num_channels):
        up_c = jnp.dot(wd, pre_ref[c], preferred_element_type=jnp.float32)
        diff = gt_ref[c].astype(jnp.float32) - up_c
        sq = diff * diff
        ss = sq if ss is None else ss + sq
    out_ref[...] = (jnp.sqrt(ss) * mask_ref[...].astype(jnp.float32)).astype(out_ref.dtype)


# ------------------------------- wrapper -------------------------------

def _round_up(x: int, m: int) -> int:
    return ((x + m - 1) // m) * m


@functools.partial(jax.jit, static_argnames=("part", "max_lane_tile"))
def tre_forward(gt, pre, mask, part=False, max_lane_tile=None):
    """gt: [B,C,D,H,W], pre: [B,C,d,h,w], mask: [B,1,D,H,W]. Only batch 0 is used (as in the module)."""
    gt0 = gt[0]          # [C, D, H, W]
    pre0 = pre[0]        # [C, d, h, w]
    mask0 = mask[0, 0]   # [D, H, W]
    C, D, H, W = gt0.shape
    _, d, h, w = pre0.shape
    N = H * W
    cdtype = gt0.dtype                      # f32 or bf16; elementwise math is always f32
    bpe = jnp.dtype(cdtype).itemsize

    wd_np, wh_np, ww_np = _interp_weights_np(D, d, H, h, W, w)
    wd = jnp.asarray(wd_np)

    # Stage 1 (cheap, runs on the low-res field only): separable upsample along W then H.
    pre_w = jnp.einsum('cdhw,Ww->cdhW', pre0.astype(jnp.float32), jnp.asarray(ww_np))
    pre_hw = jnp.einsum('cdhW,Hh->cdHW', pre_w, jnp.asarray(wh_np))
    pre_hw = pre_hw.reshape(C, d, N).astype(cdtype)      # [C, d, H*W]

    gt_flat = gt0.reshape(C, D, N)                       # [C, D, H*W]
    # bf16 mask halves/quarters mask HBM traffic; exact for {0,1} masks, math is f32 in-kernel.
    mask_flat = mask0.reshape(D, N).astype(jnp.bfloat16)  # [D, H*W]
    wd_k = wd.astype(cdtype)                             # [D, d]
    out_bpe = bpe                                        # part-map emitted in the input dtype

    # ---- generation-aware lane tiling: tn multiple of 128, floor 512, pad N to tn ----
    try:
        vmem_cap = int(pltpu.get_tpu_info().vmem_capacity_bytes)   # 64 MiB v7x, 128 MiB v5e/v6e
    except Exception:
        vmem_cap = 64 * 1024 * 1024
    vmem_limit = int(min(vmem_cap // 2, 64 << 20))       # 32 MiB on v7x, 64 MiB on v5e/v6e
    budget = (vmem_limit * 6) // 10                      # keep tiles under ~60% of the limit
    bytes_per_lane = (2 * bpe * C * (D + d)              # gt + pre_hw tiles, double-buffered
                      + 2 * 2 * D                        # bf16 mask tile, double-buffered
                      + (2 * out_bpe * D if part else 16)  # output tile (loss partials ~ tiny)
                      + 24 * D)                          # headroom for f32 temps in the body
    tn = (budget // bytes_per_lane) // 128 * 128
    tn = max(tn, 512)                                    # protect DMA / roofline efficiency
    if max_lane_tile is not None:                        # test-only override
        tn = min(tn, max(128, (max_lane_tile // 128) * 128))
    tn = min(tn, _round_up(N, 128))
    N_pad = _round_up(N, tn)
    grid_n = N_pad // tn

    if N_pad != N:
        # Explicit zero padding: padded lanes give diff=0, mask=0 -> no NaN, no contribution.
        padw = N_pad - N
        gt_flat = jnp.pad(gt_flat, ((0, 0), (0, 0), (0, padw)))
        pre_hw = jnp.pad(pre_hw, ((0, 0), (0, 0), (0, padw)))
        mask_flat = jnp.pad(mask_flat, ((0, 0), (0, padw)))

    in_specs = [
        pl.BlockSpec((C, D, tn), lambda j: (0, 0, j)),   # gt tile
        pl.BlockSpec((C, d, tn), lambda j: (0, 0, j)),   # H/W-upsampled low-res tile
        pl.BlockSpec((D, d), lambda j: (0, 0)),          # D-axis interp weights (resident)
        pl.BlockSpec((D, tn), lambda j: (0, j)),         # bf16 mask tile
    ]
    cparams = pltpu.CompilerParams(
        dimension_semantics=("parallel",),               # megacore-shardable on v7x
        vmem_limit_bytes=vmem_limit)

    if part:
        out = pl.pallas_call(
            functools.partial(_tre_part_kernel, num_channels=C),
            out_shape=jax.ShapeDtypeStruct((D, N_pad), cdtype),
            grid_spec=pltpu.PrefetchScalarGridSpec(
                num_scalar_prefetch=0,
                grid=(grid_n,),
                in_specs=in_specs,
                out_specs=pl.BlockSpec((D, tn), lambda j: (0, j)),
            ),
            compiler_params=cparams,
        )(gt_flat, pre_hw, wd_k, mask_flat)
        return out[:, :N].reshape(D, H, W)

    num_part, den_part = pl.pallas_call(
        functools.partial(_tre_loss_kernel, num_channels=C),
        out_shape=(jax.ShapeDtypeStruct((grid_n, 1, tn), jnp.float32),
                   jax.ShapeDtypeStruct((grid_n, 1, tn), jnp.float32)),
        grid_spec=pltpu.PrefetchScalarGridSpec(
            num_scalar_prefetch=0,
            grid=(grid_n,),
            in_specs=in_specs,
            out_specs=(pl.BlockSpec((1, 1, tn), lambda j: (j, 0, 0)),
                       pl.BlockSpec((1, 1, tn), lambda j: (j, 0, 0))),
        ),
        compiler_params=cparams,
    )(gt_flat, pre_hw, wd_k, mask_flat)
    # Same semantics as PyTorch: no guard against mask.sum() == 0 (inf/NaN propagates).
    return jnp.sum(num_part) / jnp.sum(den_part)


# ---------------------- pure-JAX reference (sanity) ----------------------

def tre_reference(gt, pre, mask, part=False):
    gt0, pre0, mask0 = gt[0], pre[0], mask[0, 0]
    C, D, H, W = gt0.shape
    _, d, h, w = pre0.shape
    wd_np, wh_np, ww_np = _interp_weights_np(D, d, H, h, W, w)
    up = jnp.einsum('cdhw,Ww->cdhW', pre0.astype(jnp.float32), jnp.asarray(ww_np))
    up = jnp.einsum('cdhW,Hh->cdHW', up, jnp.asarray(wh_np))
    up = jnp.einsum('cdHW,Dd->cDHW', up, jnp.asarray(wd_np))
    l1 = jnp.sqrt(jnp.sum((gt0.astype(jnp.float32) - up) ** 2, axis=0)) * mask0.astype(jnp.float32)
    if part:
        return l1
    return jnp.sum(l1) / jnp.sum(mask0.astype(jnp.float32))


if __name__ == "__main__":
    key = jax.random.PRNGKey(0)
    k1, k2, k3 = jax.random.split(key, 3)

    B, C = 1, 3            # displacement field: 3 channels
    D = H = W = 16         # ground-truth / mask spatial size
    d = h = w = 8          # prediction spatial size (upsampled inside the kernel)

    gt = jax.random.normal(k1, (B, C, D, H, W), dtype=jnp.float32)
    pre = jax.random.normal(k2, (B, C, d, h, w), dtype=jnp.float32)
    mask = (jax.random.uniform(k3, (B, 1, D, H, W)) > 0.3).astype(jnp.float32)

    ref_loss = tre_reference(gt, pre, mask, part=False)
    ref_part = tre_reference(gt, pre, mask, part=True)

    # Multi-tile grid via the test-only lane-tile cap (N=256 -> 2 tiles of 128).
    loss = tre_forward(gt, pre, mask, part=False, max_lane_tile=128)
    part_map = tre_forward(gt, pre, mask, part=True, max_lane_tile=128)
    jax.block_until_ready((loss, part_map))
    assert jnp.allclose(loss, ref_loss, atol=1e-3, rtol=1e-3)
    assert jnp.allclose(part_map, ref_part, atol=1e-3, rtol=1e-3)

    # Default tile selection (single big tile, no override).
    loss_big = tre_forward(gt, pre, mask, part=False)
    jax.block_until_ready(loss_big)
    assert jnp.allclose(loss_big, ref_loss, atol=1e-3, rtol=1e-3)

    # Awkward spatial size (H*W = 225, not a multiple of 128) -> exercises zero-padded lanes.
    H2 = W2 = 15
    gt2 = jax.random.normal(k1, (B, C, D, H2, W2), dtype=jnp.float32)
    pre2 = jax.random.normal(k2, (B, C, d, h, w), dtype=jnp.float32)
    mask2 = (jax.random.uniform(k3, (B, 1, D, H2, W2)) > 0.3).astype(jnp.float32)
    loss2 = tre_forward(gt2, pre2, mask2, part=False, max_lane_tile=128)
    part2 = tre_forward(gt2, pre2, mask2, part=True, max_lane_tile=128)
    jax.block_until_ready((loss2, part2))
    assert jnp.allclose(loss2, tre_reference(gt2, pre2, mask2, part=False), atol=1e-3, rtol=1e-3)
    assert jnp.allclose(part2, tre_reference(gt2, pre2, mask2, part=True), atol=1e-3, rtol=1e-3)

    # bf16-input path (f32 accumulation inside the kernel) — loose tolerance vs f32 reference.
    loss_bf16 = tre_forward(gt.astype(jnp.bfloat16), pre.astype(jnp.bfloat16), mask,
                            part=False, max_lane_tile=128)
    jax.block_until_ready(loss_bf16)
    assert jnp.allclose(loss_bf16, ref_loss, atol=5e-2, rtol=5e-2)

    print("KERNEL_OK")
</pallas_src>

<mosaic_0001>
module attributes {stable_mosaic.version = 11 : i64} {
  func.func @_tre_loss_kernel(%arg0: i32, %arg1: memref<3x16x128xf32, #tpu.memory_space<vmem>>, %arg2: memref<3x8x128xf32, #tpu.memory_space<vmem>>, %arg3: memref<16x8xf32, #tpu.memory_space<vmem>>, %arg4: memref<16x128xbf16, #tpu.memory_space<vmem>>, %arg5: memref<1x1x128xf32, #tpu.memory_space<vmem>>, %arg6: memref<1x1x128xf32, #tpu.memory_space<vmem>>) attributes {dimension_semantics = [#tpu.dimension_semantics<parallel>], iteration_bounds = array<i64: 2>, scalar_prefetch = 0 : i64, scratch_operands = 0 : i64, tpu.core_type = #tpu.core_type<tc>, window_params = [{transform_indices = @transform_0, window_bounds = array<i64: 3, 16, 128>}, {transform_indices = @transform_1, window_bounds = array<i64: 3, 8, 128>}, {pipeline_mode = #tpu.pipeline_mode<synchronous>, transform_indices = @transform_2, window_bounds = array<i64: 16, 8>}, {transform_indices = @transform_3, window_bounds = array<i64: 16, 128>}, {transform_indices = @transform_4, window_bounds = array<i64: 1, 1, 128>}, {transform_indices = @transform_5, window_bounds = array<i64: 1, 1, 128>}]} {
    %c0 = arith.constant 0 : index
    %c0_0 = arith.constant 0 : index
    %0 = vector.load %arg3[%c0, %c0_0] : memref<16x8xf32, #tpu.memory_space<vmem>>, vector<16x8xf32>
    %c0_1 = arith.constant 0 : index
    %c0_2 = arith.constant 0 : index
    %c0_3 = arith.constant 0 : index
    %1 = vector.load %arg2[%c0_1, %c0_2, %c0_3] : memref<3x8x128xf32, #tpu.memory_space<vmem>>, vector<1x8x128xf32>
    %2 = vector.shape_cast %1 : vector<1x8x128xf32> to vector<8x128xf32>
    %cst = arith.constant dense<0.000000e+00> : vector<16x128xf32>
    %3 = tpu.matmul %0, %2, %cst {dimension_numbers = #tpu.dot_dimension_numbers<[1], [0], [0], [1], [0, 0, 1, 1], [], []>} : vector<16x8xf32>, vector<8x128xf32>, vector<16x128xf32> -> vector<16x128xf32>
    %c0_4 = arith.constant 0 : index
    %c0_5 = arith.constant 0 : index
    %c0_6 = arith.constant 0 : index
    %4 = vector.load %arg1[%c0_4, %c0_5, %c0_6] : memref<3x16x128xf32, #tpu.memory_space<vmem>>, vector<1x16x128xf32>
    %5 = vector.shape_cast %4 : vector<1x16x128xf32> to vector<16x128xf32>
    %6 = arith.subf %5, %3 : vector<16x128xf32>
    %7 = arith.mulf %6, %6 : vector<16x128xf32>
    %c1 = arith.constant 1 : index
    %c0_7 = arith.constant 0 : index
    %c0_8 = arith.constant 0 : index
    %8 = vector.load %arg2[%c1, %c0_7, %c0_8] : memref<3x8x128xf32, #tpu.memory_space<vmem>>, vector<1x8x128xf32>
    %9 = vector.shape_cast %8 : vector<1x8x128xf32> to vector<8x128xf32>
    %cst_9 = arith.constant dense<0.000000e+00> : vector<16x128xf32>
    %10 = tpu.matmul %0, %9, %cst_9 {dimension_numbers = #tpu.dot_dimension_numbers<[1], [0], [0], [1], [0, 0, 1, 1], [], []>} : vector<16x8xf32>, vector<8x128xf32>, vector<16x128xf32> -> vector<16x128xf32>
    %c1_10 = arith.constant 1 : index
    %c0_11 = arith.constant 0 : index
    %c0_12 = arith.constant 0 : index
    %11 = vector.load %arg1[%c1_10, %c0_11, %c0_12] : memref<3x16x128xf32, #tpu.memory_space<vmem>>, vector<1x16x128xf32>
    %12 = vector.shape_cast %11 : vector<1x16x128xf32> to vector<16x128xf32>
    %13 = arith.subf %12, %10 : vector<16x128xf32>
    %14 = arith.mulf %13, %13 : vector<16x128xf32>
    %15 = arith.addf %7, %14 : vector<16x128xf32>
    %c2 = arith.constant 2 : index
    %c0_13 = arith.constant 0 : index
    %c0_14 = arith.constant 0 : index
    %16 = vector.load %arg2[%c2, %c0_13, %c0_14] : memref<3x8x128xf32, #tpu.memory_space<vmem>>, vector<1x8x128xf32>
    %17 = vector.shape_cast %16 : vector<1x8x128xf32> to vector<8x128xf32>
    %cst_15 = arith.constant dense<0.000000e+00> : vector<16x128xf32>
    %18 = tpu.matmul %0, %17, %cst_15 {dimension_numbers = #tpu.dot_dimension_numbers<[1], [0], [0], [1], [0, 0, 1, 1], [], []>} : vector<16x8xf32>, vector<8x128xf32>, vector<16x128xf32> -> vector<16x128xf32>
    %c2_16 = arith.constant 2 : index
    %c0_17 = arith.constant 0 : index
    %c0_18 = arith.constant 0 : index
    %19 = vector.load %arg1[%c2_16, %c0_17, %c0_18] : memref<3x16x128xf32, #tpu.memory_space<vmem>>, vector<1x16x128xf32>
    %20 = vector.shape_cast %19 : vector<1x16x128xf32> to vector<16x128xf32>
    %21 = arith.subf %20, %18 : vector<16x128xf32>
    %22 = arith.mulf %21, %21 : vector<16x128xf32>
    %23 = arith.addf %15, %22 : vector<16x128xf32>
    %c0_19 = arith.constant 0 : index
    %c0_20 = arith.constant 0 : index
    %24 = vector.load %arg4[%c0_19, %c0_20] : memref<16x128xbf16, #tpu.memory_space<vmem>>, vector<16x128xbf16>
    %25 = arith.extf %24 : vector<16x128xbf16> to vector<16x128xf32>
    %26 = math.sqrt %23 : vector<16x128xf32>
    %27 = arith.mulf %26, %25 : vector<16x128xf32>
    %cst_21 = arith.constant dense<0.000000e+00> : vector<128xf32>
    %28 = vector.multi_reduction <add>, %27, %cst_21 [0] : vector<16x128xf32> to vector<128xf32>
    %29 = vector.shape_cast %28 : vector<128xf32> to vector<1x1x128xf32>
    %c0_22 = arith.constant 0 : index
    %c0_23 = arith.constant 0 : index
    %c0_24 = arith.constant 0 : index
    %30 = vector.load %arg5[%c0_22, %c0_23, %c0_24] : memref<1x1x128xf32, #tpu.memory_space<vmem>>, vector<1x1x128xf32>
    tpu.vector_store %arg5[%c0_22, %c0_23, %c0_24], %29 {strides = array<i32>} : memref<1x1x128xf32, #tpu.memory_space<vmem>>, vector<1x1x128xf32>,
    %cst_25 = arith.constant dense<0.000000e+00> : vector<128xf32>
    %31 = vector.multi_reduction <add>, %25, %cst_25 [0] : vector<16x128xf32> to vector<128xf32>
    %32 = vector.shape_cast %31 : vector<128xf32> to vector<1x1x128xf32>
    %c0_26 = arith.constant 0 : index
    %c0_27 = arith.constant 0 : index
    %c0_28 = arith.constant 0 : index
    %33 = vector.load %arg6[%c0_26, %c0_27, %c0_28] : memref<1x1x128xf32, #tpu.memory_space<vmem>>, vector<1x1x128xf32>
    tpu.vector_store %arg6[%c0_26, %c0_27, %c0_28], %32 {strides = array<i32>} : memref<1x1x128xf32, #tpu.memory_space<vmem>>, vector<1x1x128xf32>,
    return
  }
  func.func @transform_0(%arg0: i32) -> (i32, i32, i32) {
    %c0_i32 = arith.constant 0 : i32
    %c0_i32_0 = arith.constant 0 : i32
    %c0_i32_1 = arith.constant 0 : i32
    return %c0_i32, %c0_i32_0, %arg0 : i32, i32, i32
  }
  func.func @transform_1(%arg0: i32) -> (i32, i32, i32) {
    %c0_i32 = arith.constant 0 : i32
    %c0_i32_0 = arith.constant 0 : i32
    %c0_i32_1 = arith.constant 0 : i32
    return %c0_i32, %c0_i32_0, %arg0 : i32, i32, i32
  }
  func.func @transform_2(%arg0: i32) -> (i32, i32) {
    %c0_i32 = arith.constant 0 : i32
    %c0_i32_0 = arith.constant 0 : i32
    %c0_i32_1 = arith.constant 0 : i32
    return %c0_i32, %c0_i32_0 : i32, i32
  }
  func.func @transform_3(%arg0: i32) -> (i32, i32) {
    %c0_i32 = arith.constant 0 : i32
    %c0_i32_0 = arith.constant 0 : i32
    return %c0_i32, %arg0 : i32, i32
  }
  func.func @transform_4(%arg0: i32) -> (i32, i32, i32) {
    %c0_i32 = arith.constant 0 : i32
    %c0_i32_0 = arith.constant 0 : i32
    %c0_i32_1 = arith.constant 0 : i32
    return %arg0, %c0_i32, %c0_i32_0 : i32, i32, i32
  }
  func.func @transform_5(%arg0: i32) -> (i32, i32, i32) {
    %c0_i32 = arith.constant 0 : i32
    %c0_i32_0 = arith.constant 0 : i32
    %c0_i32_1 = arith.constant 0 : i32
    return %arg0, %c0_i32, %c0_i32_0 : i32, i32, i32
  }
}

</mosaic_0001>

<bundles_post_ra>
// kernel: squeeze.4
= control target key start
LH: loop header
LB: loop body
LE: loop exit
PB: predicated region body
PF: predicated region fallthrough
CT: control target
= control target key end

     0   :  { %vm185_vm0 = vcmask 1043458   ;;  %s225_s6 = smov 3  ;;  %vm190_vm1 = vcmask 1045508   ;;  %vm195_vm2 = vcmask 1047558   ;;  %s228_s9 = smov 12  ;;  %vm4_vm3 = vcmask 1047556   ;;  %s4662_s0 = inlined_call_operand.vmem [shape: f32[1,3,16,16,16], index: 0, kind: input, shape index: {}]   ;;  %s4663_s1 = inlined_call_operand.vmem [shape: f32[3,16,256], index: 1, kind: output, shape index: {}]  }
   0x1   :  { %v2182_v0 = vld [vmem:[%s4662_s0 + $0x207] ss:$16 sm:%s225_s6]   ;;  %s233_s10 = smov 48  ;;  %s238_s15 = smov 192  ;;  %vm6_vm4 = vcmask 130048   ;;  %vm474_vm5 = vcmask 917248  }
   0x2   :  { %v2183_v1 = vld [vmem:[%s4662_s0 + $0x207] ss:$16 sm:%s228_s9]   ;;  %s180_s16 = smov 3  ;;  %s183_s21 = smov 12  ;;  %vm199_vm6 = vcmask 1048448   ;;  %vm749_vm7 = vcmask 786048  }
   0x3   :  { %v2184_v2 = vld [vmem:[%s4662_s0 + $0x207] ss:$16 sm:%s233_s10]   ;;  %v231_v3 = vsel %vm185_vm0, %v2183_v1, %v2182_v0  ;;  %s188_s22 = smov 48  ;;  %s193_s27 = smov 192  ;;  %vm1024_vm8 = vcmask 654848   ;;  %vm1299_vm9 = vcmask 523648  }
   0x4   :  { %v2185_v4 = vld [vmem:[%s4662_s0 + $0x207] ss:$16 sm:%s238_s15]   ;;  %v236_v6 = vsel %vm190_vm1, %v2184_v2, %v231_v3  ;;  %s248_s28 = smov 3  ;;  %s251_s4 = smov 12  ;;  %vm1574_vm10 = vcmask 392448   ;;  %vm1849_vm11 = vcmask 261248  }
   0x5   :  { %v2173_v5 = vld [vmem:[%s4662_s0 + $0x7] ss:$16 sm:%s180_s16]   ;;  %v241_v9 = vsel %vm195_vm2, %v2185_v4, %v236_v6  ;;  %v2187_v12 = vld [vmem:[%s4662_s0 + $0xf] ss:$16 sm:%s248_s28]   ;;  %s256_s5 = smov 48  ;;  %s2593_s6 = smov 112  }
   0x6   :  { %v2174_v7 = vld [vmem:[%s4662_s0 + $0x7] ss:$16 sm:%s183_s21]   ;;  %242 = vrot.lane.b32.xlu1 %v241_v9, %s2593_s6  ;;  %s261_s9 = smov 192  ;;  %s202_s10 = smov 3 }
   0x7   :  { %v2175_v8 = vld [vmem:[%s4662_s0 + $0x7] ss:$16 sm:%s188_s22]   ;;  %v186_v10 = vsel %vm185_vm0, %v2174_v7, %v2173_v5  ;;  %v2188_v14 = vld [vmem:[%s4662_s0 + $0xf] ss:$16 sm:%s251_s4]   ;;  %s205_s15 = smov 12  ;;  %s210_s16 = smov 48 }
   0x8   :  { %v2176_v11 = vld [vmem:[%s4662_s0 + $0x7] ss:$16 sm:%s193_s27]   ;;  %v191_v13 = vsel %vm190_vm1, %v2175_v8, %v186_v10  ;;  %v254_v16 = vsel %vm185_vm0, %v2188_v14, %v2187_v12  ;;  %v2189_v17 = vld [vmem:[%s4662_s0 + $0xf] ss:$16 sm:%s256_s5]   ;;  %s215_s19 = smov 192  ;;  %s294_s20 = smov 3 }
   0x9   :  { %v196_v15 = vsel %vm195_vm2, %v2176_v11, %v191_v13  ;;  %v2190_v18 = vld [vmem:[%s4662_s0 + $0xf] ss:$16 sm:%s261_s9]   ;;  %v259_v19 = vsel %vm190_vm1, %v2189_v17, %v254_v16  ;;  %v2177_v20 = vld [vmem:[%s4662_s0 + $0x107] ss:$16 sm:%s202_s10]   ;;  %s297_s25 = smov 12  ;;  %s302_s26 = smov 48 }
   0xa   :  { %197 = vrot.lane.b32.xlu0 %v196_v15, %s2593_s6  ;;  %v264_v21 = vsel %vm195_vm2, %v2190_v18, %v259_v19  ;;  %v2178_v22 = vld [vmem:[%s4662_s0 + $0x107] ss:$16 sm:%s205_s15]   ;;  %s307_s29 = smov 192  ;;  %s271_s30 = smov 3 }
   0xb   :  { %v2179_v23 = vld [vmem:[%s4662_s0 + $0x107] ss:$16 sm:%s210_s16]   ;;  %265 = vrot.lane.b32.xlu1 %v264_v21, %s2593_s6  ;;  %v208_v24 = vsel %vm185_vm0, %v2178_v22, %v2177_v20  ;;  %s274_s7 = smov 12  ;;  %s279_s8 = smov 48 }
   0xc   :  { %v2180_v25 = vld [vmem:[%s4662_s0 + $0x107] ss:$16 sm:%s215_s19]   ;;  %v213_v26 = vsel %vm190_vm1, %v2179_v23, %v208_v24  ;;  %v2197_v27 = vld [vmem:[%s4662_s0 + $0x20f] ss:$16 sm:%s294_s20]   ;;  %s284_s13 = smov 192  ;;  %s340_s16 = smov 3 }
   0xd   :  { %v2198_v28 = vld [vmem:[%s4662_s0 + $0x20f] ss:$16 sm:%s297_s25]   ;;  %v218_v29 = vsel %vm195_vm2, %v2180_v25, %v213_v26  ;;  %s343_s17 = smov 12  ;;  %s348_s22 = smov 48  ;;  %v2207_v41 = vld [vmem:[%s4662_s0 + $0x187] ss:$16 sm:%s340_s16]  }
   0xe   :  { %v300_v30 = vsel %vm185_vm0, %v2198_v28, %v2197_v27  ;;  %v2199_v31 = vld [vmem:[%s4662_s0 + $0x20f] ss:$16 sm:%s302_s26]   ;;  %219 = vrot.lane.b32.xlu0 %v218_v29, %s2593_s6  ;;  %s353_s23 = smov 192  ;;  %s317_s26 = smov 3 }
   0xf   :  { %v2200_v32 = vld [vmem:[%s4662_s0 + $0x20f] ss:$16 sm:%s307_s29]   ;;  %v305_v33 = vsel %vm190_vm1, %v2199_v31, %v300_v30  ;;  %v2208_v42 = vld [vmem:[%s4662_s0 + $0x187] ss:$16 sm:%s343_s17]   ;;  %s320_s2 = smov 12  ;;  %s325_s3 = smov 48 }
  0x10   :  { %v2192_v34 = vld [vmem:[%s4662_s0 + $0x10f] ss:$16 sm:%s271_s30]   ;;  %v310_v35 = vsel %vm195_vm2, %v2200_v32, %v305_v33  ;;  %v346_v44 = vsel %vm185_vm0, %v2208_v42, %v2207_v41  ;;  %v2209_v45 = vld [vmem:[%s4662_s0 + $0x187] ss:$16 sm:%s348_s22]   ;;  %s330_s9 = smov 192  ;;  %s386_s12 = smov 3 }
  0x11   :  { %v2193_v36 = vld [vmem:[%s4662_s0 + $0x10f] ss:$16 sm:%s274_s7]   ;;  %311 = vrot.lane.b32.xlu1 %v310_v35, %s2593_s6  ;;  %v351_v47 = vsel %vm190_vm1, %v2209_v45, %v346_v44  ;;  %s394_s18 = smov 48  ;;  %s399_s19 = smov 192 }
  0x12   :  { %v2194_v37 = vld [vmem:[%s4662_s0 + $0x10f] ss:$16 sm:%s279_s8]   ;;  %v277_v38 = vsel %vm185_vm0, %v2193_v36, %v2192_v34  ;;  %v2210_v46 = vld [vmem:[%s4662_s0 + $0x187] ss:$16 sm:%s353_s23]   ;;  %s363_s22 = smov 3  ;;  %s366_s27 = smov 12 }
  0x13   :  { %v2195_v39 = vld [vmem:[%s4662_s0 + $0x10f] ss:$16 sm:%s284_s13]   ;;  %v282_v40 = vsel %vm190_vm1, %v2194_v37, %v277_v38  ;;  %v2202_v48 = vld [vmem:[%s4662_s0 + $0x87] ss:$16 sm:%s317_s26]   ;;  %s389_s13 = smov 12  ;;  %v356_v49 = vsel %vm195_vm2, %v2210_v46, %v351_v47  ;;  %s371_s28 = smov 48 }
  0x14   :  { %v287_v43 = vsel %vm195_vm2, %v2195_v39, %v282_v40  ;;  %v2203_v50 = vld [vmem:[%s4662_s0 + $0x87] ss:$16 sm:%s320_s2]   ;;  %v2217_v55 = vld [vmem:[%s4662_s0 + $0x8f] ss:$16 sm:%s386_s12]   ;;  %s376_s4 = smov 192  ;;  %s432_s8 = smov 3 }
  0x15   :  { %288 = vrot.lane.b32.xlu0 %v287_v43, %s2593_s6  ;;  %v2204_v51 = vld [vmem:[%s4662_s0 + $0x87] ss:$16 sm:%s325_s3]   ;;  %357 = vrot.lane.b32.xlu1 %v356_v49, %s2593_s6  ;;  %v323_v52 = vsel %vm185_vm0, %v2203_v50, %v2202_v48  ;;  %s440_s14 = smov 48  ;;  %s445_s15 = smov 192 }
  0x16   :  { %v2205_v53 = vld [vmem:[%s4662_s0 + $0x87] ss:$16 sm:%s330_s9]   ;;  %v328_v54 = vsel %vm190_vm1, %v2204_v51, %v323_v52  ;;  %v2218_v56 = vld [vmem:[%s4662_s0 + $0x8f] ss:$16 sm:%s389_s13]   ;;  %s435_s9 = smov 12  ;;  %s412_s23 = smov 12 }
  0x17   :  { %v333_v57 = vsel %vm195_vm2, %v2205_v53, %v328_v54  ;;  %v392_v58 = vsel %vm185_vm0, %v2218_v56, %v2217_v55  ;;  %v2219_v59 = vld [vmem:[%s4662_s0 + $0x8f] ss:$16 sm:%s394_s18]   ;;  %v2212_v62 = vld [vmem:[%s4662_s0 + $0x287] ss:$16 sm:%s363_s22]   ;;  %s409_s18 = smov 3  ;;  %s417_s24 = smov 48 }
  0x18   :  { %v2220_v60 = vld [vmem:[%s4662_s0 + $0x8f] ss:$16 sm:%s399_s19]   ;;  %v397_v61 = vsel %vm190_vm1, %v2219_v59, %v392_v58  ;;  %v2213_v0 = vld [vmem:[%s4662_s0 + $0x287] ss:$16 sm:%s366_s27]   ;;  %s422_s29 = smov 192  ;;  %s477_s3 = smov 3 }
  0x19   :  { %334 = vrot.lane.b32.xlu0 %v333_v57, %s2593_s6  ;;  %v402_v63 = vsel %vm195_vm2, %v2220_v60, %v397_v61  ;;  %v2214_v1 = vld [vmem:[%s4662_s0 + $0x287] ss:$16 sm:%s371_s28]   ;;  %v369_v2 = vsel %vm185_vm0, %v2213_v0, %v2212_v62  ;;  %s485_s10 = smov 48  ;;  %s490_s11 = smov 192 }
  0x1a   :  { %403 = vrot.lane.b32.xlu1 %v402_v63, %s2593_s6  ;;  %v2215_v3 = vld [vmem:[%s4662_s0 + $0x287] ss:$16 sm:%s376_s4]   ;;  %v374_v4 = vsel %vm190_vm1, %v2214_v1, %v369_v2  ;;  %s480_s4 = smov 12  ;;  %s458_s19 = smov 12 }
  0x1b   :  { %v2227_v5 = vld [vmem:[%s4662_s0 + $0x28f] ss:$16 sm:%s432_s8]   ;;  %v379_v7 = vsel %vm195_vm2, %v2215_v3, %v374_v4  ;;  %v2236_v19 = vld [vmem:[%s4662_s0 + $0x106] ss:$16 sm:%s477_s3]   ;;  %s463_s20 = smov 48  ;;  %s468_s25 = smov 192 }
  0x1c   :  { %v2228_v6 = vld [vmem:[%s4662_s0 + $0x28f] ss:$16 sm:%s435_s9]   ;;  %v2237_v20 = vld [vmem:[%s4662_s0 + $0x106] ss:$16 sm:%s480_s4]   ;;  %s523_s27 = smov 3  ;;  %s526_s28 = smov 12 }
  0x1d   :  { %v438_v8 = vsel %vm185_vm0, %v2228_v6, %v2227_v5  ;;  %v2229_v9 = vld [vmem:[%s4662_s0 + $0x28f] ss:$16 sm:%s440_s14]   ;;  %380 = vrot.lane.b32.xlu0 %v379_v7, %s2593_s6  ;;  %s455_s14 = smov 3  ;;  %v483_v22 = vsel %vm185_vm0, %v2237_v20, %v2236_v19  ;;  %s531_s4 = smov 48 }
  0x1e   :  { %v2230_v10 = vld [vmem:[%s4662_s0 + $0x28f] ss:$16 sm:%s445_s15]   ;;  %v443_v11 = vsel %vm190_vm1, %v2229_v9, %v438_v8  ;;  %v2238_v23 = vld [vmem:[%s4662_s0 + $0x106] ss:$16 sm:%s485_s10]   ;;  %s536_s5 = smov 192  ;;  %s2594_s7 = smov 96  }
  0x1f   :  { %v2222_v12 = vld [vmem:[%s4662_s0 + $0x18f] ss:$16 sm:%s409_s18]   ;;  %v448_v13 = vsel %vm195_vm2, %v2230_v10, %v443_v11  ;;  %v2239_v24 = vld [vmem:[%s4662_s0 + $0x106] ss:$16 sm:%s490_s11]   ;;  %v488_v25 = vsel %vm190_vm1, %v2238_v23, %v483_v22  ;;  %s500_s10 = smov 3  ;;  %s503_s15 = smov 12 }
  0x20   :  { %v2223_v14 = vld [vmem:[%s4662_s0 + $0x18f] ss:$16 sm:%s412_s23]   ;;  %449 = vrot.lane.b32.xlu1 %v448_v13, %s2593_s6  ;;  %v493_v27 = vsel %vm195_vm2, %v2239_v24, %v488_v25  ;;  %s508_s16 = smov 48  ;;  %s513_s21 = smov 192 }
  0x21   :  { %v2224_v15 = vld [vmem:[%s4662_s0 + $0x18f] ss:$16 sm:%s417_s24]   ;;  %v415_v16 = vsel %vm185_vm0, %v2223_v14, %v2222_v12  ;;  %v2232_v26 = vld [vmem:[%s4662_s0 + $0x6] ss:$16 sm:%s455_s14]   ;;  %s569_s24 = smov 3  ;;  %s582_s30 = smov 192 }
  0x22   :  { %v2225_v17 = vld [vmem:[%s4662_s0 + $0x18f] ss:$16 sm:%s422_s29]   ;;  %v420_v18 = vsel %vm190_vm1, %v2224_v15, %v415_v16  ;;  %v2233_v28 = vld [vmem:[%s4662_s0 + $0x6] ss:$16 sm:%s458_s19]   ;;  %s577_s29 = smov 48  ;;  %s549_s11 = smov 12 }
  0x23   :  { %v425_v21 = vsel %vm195_vm2, %v2225_v17, %v420_v18  ;;  %v2234_v29 = vld [vmem:[%s4662_s0 + $0x6] ss:$16 sm:%s463_s20]   ;;  %v461_v30 = vsel %vm185_vm0, %v2233_v28, %v2232_v26  ;;  %v2246_v33 = vld [vmem:[%s4662_s0 + $0xe] ss:$16 sm:%s523_s27]   ;;  %s554_s12 = smov 48  ;;  %s559_s17 = smov 192 }
  0x24   :  { %426 = vrot.lane.b32.xlu0 %v425_v21, %s2593_s6  ;;  %494 = vrot.lane.b32.xlu1 %v493_v27, %s2594_s7  ;;  %v2235_v31 = vld [vmem:[%s4662_s0 + $0x6] ss:$16 sm:%s468_s25]   ;;  %v466_v32 = vsel %vm190_vm1, %v2234_v29, %v461_v30  ;;  %s572_s25 = smov 12  ;;  %s615_s20 = smov 3 }
  0x25   :  { %v2247_v34 = vld [vmem:[%s4662_s0 + $0xe] ss:$16 sm:%s526_s28]   ;;  %v471_v35 = vsel %vm195_vm2, %v2235_v31, %v466_v32  ;;  %v2241_v40 = vld [vmem:[%s4662_s0 + $0x206] ss:$16 sm:%s500_s10]   ;;  %s623_s6 = smov 48  ;;  %s628_s26 = smov 192 }
  0x26   :  { %v529_v36 = vsel %vm185_vm0, %v2247_v34, %v2246_v33  ;;  %v2248_v37 = vld [vmem:[%s4662_s0 + $0xe] ss:$16 sm:%s531_s4]   ;;  %v2242_v42 = vld [vmem:[%s4662_s0 + $0x206] ss:$16 sm:%s503_s15]   ;;  %s546_s4 = smov 3  ;;  %s600_s8 = smov 48 }
  0x27   :  { %v2249_v38 = vld [vmem:[%s4662_s0 + $0xe] ss:$16 sm:%s536_s5]   ;;  %v534_v39 = vsel %vm190_vm1, %v2248_v37, %v529_v36  ;;  %v2243_v43 = vld [vmem:[%s4662_s0 + $0x206] ss:$16 sm:%s508_s16]   ;;  %v506_v44 = vsel %vm185_vm0, %v2242_v42, %v2241_v40  ;;  %s595_s5 = smov 12  ;;  %s605_s13 = smov 192 }
  0x28   :  { %472 = vrot.lane.b32.xlu0 %v471_v35, %s2594_s7  ;;  %v539_v41 = vsel %vm195_vm2, %v2249_v38, %v534_v39  ;;  %v2244_v45 = vld [vmem:[%s4662_s0 + $0x206] ss:$16 sm:%s513_s21]   ;;  %v511_v46 = vsel %vm190_vm1, %v2243_v43, %v506_v44  ;;  %s618_s21 = smov 12  ;;  %s661_s16 = smov 3 }
  0x29   :  { %540 = vrot.lane.b32.xlu1 %v539_v41, %s2594_s7  ;;  %v2256_v47 = vld [vmem:[%s4662_s0 + $0x20e] ss:$16 sm:%s569_s24]   ;;  %v516_v49 = vsel %vm195_vm2, %v2244_v45, %v511_v46  ;;  %s669_s22 = smov 48  ;;  %s674_s23 = smov 192 }
  0x2a   :  { %v2257_v48 = vld [vmem:[%s4662_s0 + $0x20e] ss:$16 sm:%s572_s25]   ;;  %v2266_v61 = vld [vmem:[%s4662_s0 + $0x186] ss:$16 sm:%s615_s20]   ;;  %s646_s2 = smov 48  ;;  %s651_s9 = smov 192 }
  0x2b   :  { %v575_v50 = vsel %vm185_vm0, %v2257_v48, %v2256_v47  ;;  %v2258_v51 = vld [vmem:[%s4662_s0 + $0x20e] ss:$16 sm:%s577_s29]   ;;  %s592_s29 = smov 3  ;;  %v2267_v62 = vld [vmem:[%s4662_s0 + $0x186] ss:$16 sm:%s618_s21]   ;;  %s715_s18 = smov 48 }
  0x2c   :  { %v2259_v52 = vld [vmem:[%s4662_s0 + $0x20e] ss:$16 sm:%s582_s30]   ;;  %517 = vrot.lane.b32.xlu0 %v516_v49, %s2594_s7  ;;  %v580_v53 = vsel %vm190_vm1, %v2258_v51, %v575_v50  ;;  %v621_v0 = vsel %vm185_vm0, %v2267_v62, %v2266_v61  ;;  %s641_s30 = smov 12  ;;  %s720_s19 = smov 192 }
  0x2d   :  { %v2251_v54 = vld [vmem:[%s4662_s0 + $0x10e] ss:$16 sm:%s546_s4]   ;;  %v585_v55 = vsel %vm195_vm2, %v2259_v52, %v580_v53  ;;  %v2268_v1 = vld [vmem:[%s4662_s0 + $0x186] ss:$16 sm:%s623_s6]   ;;  %s638_s6 = smov 3  ;;  %s692_s27 = smov 48 }
  0x2e   :  { %v2252_v56 = vld [vmem:[%s4662_s0 + $0x10e] ss:$16 sm:%s549_s11]   ;;  %586 = vrot.lane.b32.xlu1 %v585_v55, %s2594_s7  ;;  %v626_v3 = vsel %vm190_vm1, %v2268_v1, %v621_v0  ;;  %s697_s3 = smov 192  ;;  %s760_s14 = smov 48 }
  0x2f   :  { %v2253_v57 = vld [vmem:[%s4662_s0 + $0x10e] ss:$16 sm:%s554_s12]   ;;  %v552_v58 = vsel %vm185_vm0, %v2252_v56, %v2251_v54  ;;  %v2269_v2 = vld [vmem:[%s4662_s0 + $0x186] ss:$16 sm:%s628_s26]   ;;  %s707_s12 = smov 3  ;;  %s687_s26 = smov 12 }
  0x30   :  { %v2254_v59 = vld [vmem:[%s4662_s0 + $0x10e] ss:$16 sm:%s559_s17]   ;;  %v557_v60 = vsel %vm190_vm1, %v2253_v57, %v552_v58  ;;  %v2261_v4 = vld [vmem:[%s4662_s0 + $0x86] ss:$16 sm:%s592_s29]   ;;  %s664_s17 = smov 12  ;;  %v631_v5 = vsel %vm195_vm2, %v2269_v2, %v626_v3  ;;  %s765_s15 = smov 192 }
  0x31   :  { %v562_v63 = vsel %vm195_vm2, %v2254_v59, %v557_v60  ;;  %v2262_v6 = vld [vmem:[%s4662_s0 + $0x86] ss:$16 sm:%s595_s5]   ;;  %v2276_v11 = vld [vmem:[%s4662_s0 + $0x8e] ss:$16 sm:%s661_s16]   ;;  %s738_s24 = smov 48  ;;  %s743_s28 = smov 192 }
  0x32   :  { %563 = vrot.lane.b32.xlu0 %v562_v63, %s2594_s7  ;;  %v2263_v7 = vld [vmem:[%s4662_s0 + $0x86] ss:$16 sm:%s600_s8]   ;;  %632 = vrot.lane.b32.xlu1 %v631_v5, %s2594_s7  ;;  %v598_v8 = vsel %vm185_vm0, %v2262_v6, %v2261_v4  ;;  %s752_s8 = smov 3  ;;  %s811_s10 = smov 192 }
  0x33   :  { %v2264_v9 = vld [vmem:[%s4662_s0 + $0x86] ss:$16 sm:%s605_s13]   ;;  %v603_v10 = vsel %vm190_vm1, %v2263_v7, %v598_v8  ;;  %v2277_v12 = vld [vmem:[%s4662_s0 + $0x8e] ss:$16 sm:%s664_s17]   ;;  %s710_s13 = smov 12  ;;  %s2595_s11 = smov 80  }
  0x34   :  { %v608_v13 = vsel %vm195_vm2, %v2264_v9, %v603_v10  ;;  %v667_v14 = vsel %vm185_vm0, %v2277_v12, %v2276_v11  ;;  %v2278_v15 = vld [vmem:[%s4662_s0 + $0x8e] ss:$16 sm:%s669_s22]   ;;  %v2271_v18 = vld [vmem:[%s4662_s0 + $0x286] ss:$16 sm:%s638_s6]   ;;  %s684_s22 = smov 3  ;;  %s783_s20 = smov 48 }
  0x35   :  { %v2279_v16 = vld [vmem:[%s4662_s0 + $0x8e] ss:$16 sm:%s674_s23]   ;;  %v672_v17 = vsel %vm190_vm1, %v2278_v15, %v667_v14  ;;  %v2272_v20 = vld [vmem:[%s4662_s0 + $0x286] ss:$16 sm:%s641_s30]   ;;  %s733_s23 = smov 12  ;;  %s798_s30 = smov 3 }
  0x36   :  { %609 = vrot.lane.b32.xlu0 %v608_v13, %s2594_s7  ;;  %v677_v19 = vsel %vm195_vm2, %v2279_v16, %v672_v17  ;;  %v2273_v21 = vld [vmem:[%s4662_s0 + $0x286] ss:$16 sm:%s646_s2]   ;;  %v644_v22 = vsel %vm185_vm0, %v2272_v20, %v2271_v18  ;;  %s801_s2 = smov 12  ;;  %s788_s25 = smov 192 }
  0x37   :  { %678 = vrot.lane.b32.xlu1 %v677_v19, %s2594_s7  ;;  %v2274_v23 = vld [vmem:[%s4662_s0 + $0x286] ss:$16 sm:%s651_s9]   ;;  %v649_v24 = vsel %vm190_vm1, %v2273_v21, %v644_v22  ;;  %s755_s9 = smov 12  ;;  %s857_s4 = smov 192 }
  0x38   :  { %v2286_v25 = vld [vmem:[%s4662_s0 + $0x28e] ss:$16 sm:%s707_s12]   ;;  %v654_v27 = vsel %vm195_vm2, %v2274_v23, %v649_v24  ;;  %v2295_v39 = vld [vmem:[%s4662_s0 + $0x105] ss:$16 sm:%s752_s8]   ;;  %s829_s16 = smov 48  ;;  %s834_s21 = smov 192 }
  0x39   :  { %v2287_v26 = vld [vmem:[%s4662_s0 + $0x28e] ss:$16 sm:%s710_s13]   ;;  %v2296_v40 = vld [vmem:[%s4662_s0 + $0x105] ss:$16 sm:%s755_s9]   ;;  %s806_s9 = smov 48  ;;  %s903_s29 = smov 192 }
  0x3a   :  { %v713_v28 = vsel %vm185_vm0, %v2287_v26, %v2286_v25  ;;  %v2288_v29 = vld [vmem:[%s4662_s0 + $0x28e] ss:$16 sm:%s715_s18]   ;;  %655 = vrot.lane.b32.xlu0 %v654_v27, %s2594_s7  ;;  %s730_s18 = smov 3  ;;  %v758_v42 = vsel %vm185_vm0, %v2296_v40, %v2295_v39  ;;  %s875_s12 = smov 48 }
  0x3b   :  { %v2289_v30 = vld [vmem:[%s4662_s0 + $0x28e] ss:$16 sm:%s720_s19]   ;;  %v718_v31 = vsel %vm190_vm1, %v2288_v29, %v713_v28  ;;  %v2297_v43 = vld [vmem:[%s4662_s0 + $0x105] ss:$16 sm:%s760_s14]   ;;  %s775_s14 = smov 3  ;;  %s778_s19 = smov 12 }
  0x3c   :  { %v2281_v32 = vld [vmem:[%s4662_s0 + $0x18e] ss:$16 sm:%s684_s22]   ;;  %v723_v33 = vsel %vm195_vm2, %v2289_v30, %v718_v31  ;;  %v2298_v44 = vld [vmem:[%s4662_s0 + $0x105] ss:$16 sm:%s765_s15]   ;;  %v763_v45 = vsel %vm190_vm1, %v2297_v43, %v758_v42  ;;  %s824_s15 = smov 12  ;;  %s880_s17 = smov 192 }
  0x3d   :  { %v2282_v34 = vld [vmem:[%s4662_s0 + $0x18e] ss:$16 sm:%s687_s26]   ;;  %724 = vrot.lane.b32.xlu1 %v723_v33, %s2594_s7  ;;  %v768_v47 = vsel %vm195_vm2, %v2298_v44, %v763_v45  ;;  %s944_s6 = smov 48  ;;  %s949_s26 = smov 192 }
  0x3e   :  { %v2283_v35 = vld [vmem:[%s4662_s0 + $0x18e] ss:$16 sm:%s692_s27]   ;;  %v690_v36 = vsel %vm185_vm0, %v2282_v34, %v2281_v32  ;;  %v2291_v46 = vld [vmem:[%s4662_s0 + $0x5] ss:$16 sm:%s730_s18]   ;;  %s844_s27 = smov 3  ;;  %s921_s5 = smov 48 }
  0x3f   :  { %v2284_v37 = vld [vmem:[%s4662_s0 + $0x18e] ss:$16 sm:%s697_s3]   ;;  %v695_v38 = vsel %vm190_vm1, %v2283_v35, %v690_v36  ;;  %v2292_v48 = vld [vmem:[%s4662_s0 + $0x5] ss:$16 sm:%s733_s23]   ;;  %s852_s3 = smov 48  ;;  %s926_s13 = smov 192 }
  0x40   :  { %v700_v41 = vsel %vm195_vm2, %v2284_v37, %v695_v38  ;;  %v2293_v49 = vld [vmem:[%s4662_s0 + $0x5] ss:$16 sm:%s738_s24]   ;;  %v736_v50 = vsel %vm185_vm0, %v2292_v48, %v2291_v46  ;;  %v2305_v53 = vld [vmem:[%s4662_s0 + $0xd] ss:$16 sm:%s798_s30]   ;;  %s890_s24 = smov 3  ;;  %s990_s22 = smov 48 }
  0x41   :  { %701 = vrot.lane.b32.xlu0 %v700_v41, %s2594_s7  ;;  %769 = vrot.lane.b32.xlu1 %v768_v47, %s2595_s11  ;;  %v2294_v51 = vld [vmem:[%s4662_s0 + $0x5] ss:$16 sm:%s743_s28]   ;;  %v741_v52 = vsel %vm190_vm1, %v2293_v49, %v736_v50  ;;  %s847_s28 = smov 12  ;;  %s898_s7 = smov 48 }
  0x42   :  { %v2306_v54 = vld [vmem:[%s4662_s0 + $0xd] ss:$16 sm:%s801_s2]   ;;  %v746_v55 = vsel %vm195_vm2, %v2294_v51, %v741_v52  ;;  %v2300_v60 = vld [vmem:[%s4662_s0 + $0x205] ss:$16 sm:%s775_s14]   ;;  %s995_s23 = smov 192  ;;  %s967_s30 = smov 48 }
  0x43   :  { %v804_v56 = vsel %vm185_vm0, %v2306_v54, %v2305_v53  ;;  %v2307_v57 = vld [vmem:[%s4662_s0 + $0xd] ss:$16 sm:%s806_s9]   ;;  %v2301_v62 = vld [vmem:[%s4662_s0 + $0x205] ss:$16 sm:%s778_s19]   ;;  %s821_s9 = smov 3  ;;  %s972_s8 = smov 192 }
  0x44   :  { %v2308_v58 = vld [vmem:[%s4662_s0 + $0xd] ss:$16 sm:%s811_s10]   ;;  %v809_v59 = vsel %vm190_vm1, %v2307_v57, %v804_v56  ;;  %v2302_v63 = vld [vmem:[%s4662_s0 + $0x205] ss:$16 sm:%s783_s20]   ;;  %v781_v0 = vsel %vm185_vm0, %v2301_v62, %v2300_v60  ;;  %s870_s10 = smov 12  ;;  %s936_s20 = smov 3 }
  0x45   :  { %747 = vrot.lane.b32.xlu0 %v746_v55, %s2595_s11  ;;  %v814_v61 = vsel %vm195_vm2, %v2308_v58, %v809_v59  ;;  %v2303_v1 = vld [vmem:[%s4662_s0 + $0x205] ss:$16 sm:%s788_s25]   ;;  %v786_v2 = vsel %vm190_vm1, %v2302_v63, %v781_v0  ;;  %s893_s25 = smov 12  ;;  %s1035_s18 = smov 48 }
  0x46   :  { %815 = vrot.lane.b32.xlu1 %v814_v61, %s2595_s11  ;;  %v2315_v3 = vld [vmem:[%s4662_s0 + $0x20d] ss:$16 sm:%s844_s27]   ;;  %v791_v5 = vsel %vm195_vm2, %v2303_v1, %v786_v2  ;;  %s1040_s19 = smov 192  ;;  %s1013_s27 = smov 48 }
  0x47   :  { %v2316_v4 = vld [vmem:[%s4662_s0 + $0x20d] ss:$16 sm:%s847_s28]   ;;  %v2325_v17 = vld [vmem:[%s4662_s0 + $0x185] ss:$16 sm:%s890_s24]   ;;  %s1018_s2 = smov 192  ;;  %s1086_s14 = smov 192 }
  0x48   :  { %v850_v6 = vsel %vm185_vm0, %v2316_v4, %v2315_v3  ;;  %v2317_v7 = vld [vmem:[%s4662_s0 + $0x20d] ss:$16 sm:%s852_s3]   ;;  %s867_s3 = smov 3  ;;  %v2326_v18 = vld [vmem:[%s4662_s0 + $0x185] ss:$16 sm:%s893_s25]   ;;  %s1058_s24 = smov 48 }
  0x49   :  { %v2318_v8 = vld [vmem:[%s4662_s0 + $0x20d] ss:$16 sm:%s857_s4]   ;;  %792 = vrot.lane.b32.xlu0 %v791_v5, %s2595_s11  ;;  %v855_v9 = vsel %vm190_vm1, %v2317_v7, %v850_v6  ;;  %v896_v20 = vsel %vm185_vm0, %v2326_v18, %v2325_v17  ;;  %s916_s4 = smov 12  ;;  %s1063_s28 = smov 192 }
  0x4a   :  { %v2310_v10 = vld [vmem:[%s4662_s0 + $0x10d] ss:$16 sm:%s821_s9]   ;;  %v860_v11 = vsel %vm195_vm2, %v2318_v8, %v855_v9  ;;  %v2327_v21 = vld [vmem:[%s4662_s0 + $0x185] ss:$16 sm:%s898_s7]   ;;  %s913_s7 = smov 3  ;;  %s1132_s9 = smov 192 }
  0x4b   :  { %v2311_v12 = vld [vmem:[%s4662_s0 + $0x10d] ss:$16 sm:%s824_s15]   ;;  %861 = vrot.lane.b32.xlu1 %v860_v11, %s2595_s11  ;;  %v901_v23 = vsel %vm190_vm1, %v2327_v21, %v896_v20  ;;  %s2596_s15 = smov 64   ;;  %s1109_s25 = smov 192 }
  0x4c   :  { %v2312_v13 = vld [vmem:[%s4662_s0 + $0x10d] ss:$16 sm:%s829_s16]   ;;  %v827_v14 = vsel %vm185_vm0, %v2311_v12, %v2310_v10  ;;  %v2328_v22 = vld [vmem:[%s4662_s0 + $0x185] ss:$16 sm:%s903_s29]   ;;  %s982_s16 = smov 3  ;;  %s962_s29 = smov 12 }
  0x4d   :  { %v2313_v15 = vld [vmem:[%s4662_s0 + $0x10d] ss:$16 sm:%s834_s21]   ;;  %v832_v16 = vsel %vm190_vm1, %v2312_v13, %v827_v14  ;;  %v2320_v24 = vld [vmem:[%s4662_s0 + $0x85] ss:$16 sm:%s867_s3]   ;;  %s939_s21 = smov 12  ;;  %v906_v25 = vsel %vm195_vm2, %v2328_v22, %v901_v23  ;;  %s1178_s3 = smov 192 }
  0x4e   :  { %v837_v19 = vsel %vm195_vm2, %v2313_v15, %v832_v16  ;;  %v2321_v26 = vld [vmem:[%s4662_s0 + $0x85] ss:$16 sm:%s870_s10]   ;;  %v2335_v31 = vld [vmem:[%s4662_s0 + $0x8d] ss:$16 sm:%s936_s20]   ;;  %s1104_s20 = smov 48  ;;  %s1196_s10 = smov 48 }
  0x4f   :  { %838 = vrot.lane.b32.xlu0 %v837_v19, %s2595_s11  ;;  %v2322_v27 = vld [vmem:[%s4662_s0 + $0x85] ss:$16 sm:%s875_s12]   ;;  %907 = vrot.lane.b32.xlu1 %v906_v25, %s2595_s11  ;;  %v873_v28 = vsel %vm185_vm0, %v2321_v26, %v2320_v24  ;;  %s1027_s12 = smov 3 }
  0x50   :  { %v2323_v29 = vld [vmem:[%s4662_s0 + $0x85] ss:$16 sm:%s880_s17]   ;;  %v878_v30 = vsel %vm190_vm1, %v2322_v27, %v873_v28  ;;  %v2336_v32 = vld [vmem:[%s4662_s0 + $0x8d] ss:$16 sm:%s939_s21]   ;;  %s985_s17 = smov 12  ;;  %s1155_s21 = smov 192 }
  0x51   :  { %v883_v33 = vsel %vm195_vm2, %v2323_v29, %v878_v30  ;;  %v942_v34 = vsel %vm185_vm0, %v2336_v32, %v2335_v31  ;;  %v2337_v35 = vld [vmem:[%s4662_s0 + $0x8d] ss:$16 sm:%s944_s6]   ;;  %v2330_v38 = vld [vmem:[%s4662_s0 + $0x285] ss:$16 sm:%s913_s7]   ;;  %s959_s6 = smov 3  ;;  %s1219_s7 = smov 48 }
  0x52   :  { %v2338_v36 = vld [vmem:[%s4662_s0 + $0x8d] ss:$16 sm:%s949_s26]   ;;  %v947_v37 = vsel %vm190_vm1, %v2337_v35, %v942_v34  ;;  %v2331_v40 = vld [vmem:[%s4662_s0 + $0x285] ss:$16 sm:%s916_s4]   ;;  %s1008_s26 = smov 12  ;;  %s1073_s4 = smov 3 }
  0x53   :  { %884 = vrot.lane.b32.xlu0 %v883_v33, %s2595_s11  ;;  %v952_v39 = vsel %vm195_vm2, %v2338_v36, %v947_v37  ;;  %v2332_v41 = vld [vmem:[%s4662_s0 + $0x285] ss:$16 sm:%s921_s5]   ;;  %v919_v42 = vsel %vm185_vm0, %v2331_v40, %v2330_v38  ;;  %s1076_s5 = smov 12 }
  0x54   :  { %953 = vrot.lane.b32.xlu1 %v952_v39, %s2595_s11  ;;  %v2333_v43 = vld [vmem:[%s4662_s0 + $0x285] ss:$16 sm:%s926_s13]   ;;  %v924_v44 = vsel %vm190_vm1, %v2332_v41, %v919_v42  ;;  %s1030_s13 = smov 12 }
  0x55   :  { %v2345_v45 = vld [vmem:[%s4662_s0 + $0x28d] ss:$16 sm:%s982_s16]   ;;  %v929_v47 = vsel %vm195_vm2, %v2333_v43, %v924_v44  ;;  %v2354_v59 = vld [vmem:[%s4662_s0 + $0x104] ss:$16 sm:%s1027_s12]   ;;  %s1150_s16 = smov 48  ;;  %s1247_s12 = smov 192 }
  0x56   :  { %v2346_v46 = vld [vmem:[%s4662_s0 + $0x28d] ss:$16 sm:%s985_s17]   ;;  %v2355_v60 = vld [vmem:[%s4662_s0 + $0x104] ss:$16 sm:%s1030_s13]   ;;  %s1081_s13 = smov 48  ;;  %s1201_s17 = smov 192 }
  0x57   :  { %v988_v48 = vsel %vm185_vm0, %v2346_v46, %v2345_v45  ;;  %v2347_v49 = vld [vmem:[%s4662_s0 + $0x28d] ss:$16 sm:%s990_s22]   ;;  %930 = vrot.lane.b32.xlu0 %v929_v47, %s2595_s11  ;;  %s1005_s22 = smov 3  ;;  %v1033_v62 = vsel %vm185_vm0, %v2355_v60, %v2354_v59 }
  0x58   :  { %v2348_v50 = vld [vmem:[%s4662_s0 + $0x28d] ss:$16 sm:%s995_s23]   ;;  %v993_v51 = vsel %vm190_vm1, %v2347_v49, %v988_v48  ;;  %v2356_v63 = vld [vmem:[%s4662_s0 + $0x104] ss:$16 sm:%s1035_s18]   ;;  %s1050_s18 = smov 3  ;;  %s1053_s23 = smov 12 }
  0x59   :  { %v2340_v52 = vld [vmem:[%s4662_s0 + $0x18d] ss:$16 sm:%s959_s6]   ;;  %v998_v53 = vsel %vm195_vm2, %v2348_v50, %v993_v51  ;;  %v2357_v0 = vld [vmem:[%s4662_s0 + $0x104] ss:$16 sm:%s1040_s19]   ;;  %v1038_v1 = vsel %vm190_vm1, %v2356_v63, %v1033_v62  ;;  %s1099_s19 = smov 12  ;;  %s1265_s6 = smov 48 }
  0x5a   :  { %v2341_v54 = vld [vmem:[%s4662_s0 + $0x18d] ss:$16 sm:%s962_s29]   ;;  %999 = vrot.lane.b32.xlu1 %v998_v53, %s2595_s11  ;;  %v1043_v3 = vsel %vm195_vm2, %v2357_v0, %v1038_v1  ;;  %s1224_s29 = smov 192 }
  0x5b   :  { %v2342_v55 = vld [vmem:[%s4662_s0 + $0x18d] ss:$16 sm:%s967_s30]   ;;  %v965_v56 = vsel %vm185_vm0, %v2341_v54, %v2340_v52  ;;  %v2350_v2 = vld [vmem:[%s4662_s0 + $0x4] ss:$16 sm:%s1005_s22]   ;;  %s1119_s30 = smov 3  ;;  %s1310_s22 = smov 48 }
  0x5c   :  { %v2343_v57 = vld [vmem:[%s4662_s0 + $0x18d] ss:$16 sm:%s972_s8]   ;;  %v970_v58 = vsel %vm190_vm1, %v2342_v55, %v965_v56  ;;  %v2351_v4 = vld [vmem:[%s4662_s0 + $0x4] ss:$16 sm:%s1008_s26]   ;;  %s1127_s8 = smov 48  ;;  %s1270_s26 = smov 192 }
  0x5d   :  { %v975_v61 = vsel %vm195_vm2, %v2343_v57, %v970_v58  ;;  %v2352_v5 = vld [vmem:[%s4662_s0 + $0x4] ss:$16 sm:%s1013_s27]   ;;  %v1011_v6 = vsel %vm185_vm0, %v2351_v4, %v2350_v2  ;;  %v2364_v9 = vld [vmem:[%s4662_s0 + $0xc] ss:$16 sm:%s1073_s4]   ;;  %s1165_s27 = smov 3  ;;  %s1242_s4 = smov 48 }
  0x5e   :  { %976 = vrot.lane.b32.xlu0 %v975_v61, %s2595_s11  ;;  %1044 = vrot.lane.b32.xlu1 %v1043_v3, %s2596_s15  ;;  %v2353_v7 = vld [vmem:[%s4662_s0 + $0x4] ss:$16 sm:%s1018_s2]   ;;  %v1016_v8 = vsel %vm190_vm1, %v2352_v5, %v1011_v6  ;;  %s1122_s2 = smov 12  ;;  %s1173_s11 = smov 48 }
  0x5f   :  { %v2365_v10 = vld [vmem:[%s4662_s0 + $0xc] ss:$16 sm:%s1076_s5]   ;;  %v1021_v11 = vsel %vm195_vm2, %v2353_v7, %v1016_v8  ;;  %v2359_v16 = vld [vmem:[%s4662_s0 + $0x204] ss:$16 sm:%s1050_s18]   ;;  %s1293_s5 = smov 192  ;;  %s1361_s18 = smov 192 }
  0x60   :  { %v1079_v12 = vsel %vm185_vm0, %v2365_v10, %v2364_v9  ;;  %v2366_v13 = vld [vmem:[%s4662_s0 + $0xc] ss:$16 sm:%s1081_s13]   ;;  %v2360_v18 = vld [vmem:[%s4662_s0 + $0x204] ss:$16 sm:%s1053_s23]   ;;  %s1096_s13 = smov 3  ;;  %s1315_s23 = smov 192 }
  0x61   :  { %v2367_v14 = vld [vmem:[%s4662_s0 + $0xc] ss:$16 sm:%s1086_s14]   ;;  %v1084_v15 = vsel %vm190_vm1, %v2366_v13, %v1079_v12  ;;  %v2361_v19 = vld [vmem:[%s4662_s0 + $0x204] ss:$16 sm:%s1058_s24]   ;;  %v1056_v20 = vsel %vm185_vm0, %v2360_v18, %v2359_v16  ;;  %s1145_s14 = smov 12  ;;  %s1211_s24 = smov 3 }
  0x62   :  { %1022 = vrot.lane.b32.xlu0 %v1021_v11, %s2596_s15  ;;  %v1089_v17 = vsel %vm195_vm2, %v2367_v14, %v1084_v15  ;;  %v2362_v21 = vld [vmem:[%s4662_s0 + $0x204] ss:$16 sm:%s1063_s28]   ;;  %v1061_v22 = vsel %vm190_vm1, %v2361_v19, %v1056_v20  ;;  %s1168_s28 = smov 12 }
  0x63   :  { %1090 = vrot.lane.b32.xlu1 %v1089_v17, %s2596_s15  ;;  %v2374_v23 = vld [vmem:[%s4662_s0 + $0x20c] ss:$16 sm:%s1119_s30]   ;;  %v1066_v25 = vsel %vm195_vm2, %v2362_v21, %v1061_v22  ;;  %s1288_s30 = smov 48 }
  0x64   :  { %v2375_v24 = vld [vmem:[%s4662_s0 + $0x20c] ss:$16 sm:%s1122_s2]   ;;  %v2384_v37 = vld [vmem:[%s4662_s0 + $0x184] ss:$16 sm:%s1165_s27]   ;;  %s1333_s27 = smov 48  ;;  %s1338_s2 = smov 192 }
  0x65   :  { %v1125_v26 = vsel %vm185_vm0, %v2375_v24, %v2374_v23  ;;  %v2376_v27 = vld [vmem:[%s4662_s0 + $0x20c] ss:$16 sm:%s1127_s8]   ;;  %s1142_s8 = smov 3  ;;  %v2385_v38 = vld [vmem:[%s4662_s0 + $0x184] ss:$16 sm:%s1168_s28]   ;;  %s1384_s28 = smov 192 }
  0x66   :  { %v2377_v28 = vld [vmem:[%s4662_s0 + $0x20c] ss:$16 sm:%s1132_s9]   ;;  %1067 = vrot.lane.b32.xlu0 %v1066_v25, %s2596_s15  ;;  %v1130_v29 = vsel %vm190_vm1, %v2376_v27, %v1125_v26  ;;  %v1171_v40 = vsel %vm185_vm0, %v2385_v38, %v2384_v37  ;;  %s1191_s9 = smov 12 }
  0x67   :  { %v2369_v30 = vld [vmem:[%s4662_s0 + $0x10c] ss:$16 sm:%s1096_s13]   ;;  %v1135_v31 = vsel %vm195_vm2, %v2377_v28, %v1130_v29  ;;  %v2386_v41 = vld [vmem:[%s4662_s0 + $0x184] ss:$16 sm:%s1173_s11]   ;;  %s1188_s11 = smov 3  ;;  %s1407_s13 = smov 192 }
  0x68   :  { %v2370_v32 = vld [vmem:[%s4662_s0 + $0x10c] ss:$16 sm:%s1099_s19]   ;;  %1136 = vrot.lane.b32.xlu1 %v1135_v31, %s2596_s15  ;;  %v1176_v43 = vsel %vm190_vm1, %v2386_v41, %v1171_v40  ;;  %s2597_s19 = smov 48  }
  0x69   :  { %v2371_v33 = vld [vmem:[%s4662_s0 + $0x10c] ss:$16 sm:%s1104_s20]   ;;  %v1102_v34 = vsel %vm185_vm0, %v2370_v32, %v2369_v30  ;;  %v2387_v42 = vld [vmem:[%s4662_s0 + $0x184] ss:$16 sm:%s1178_s3]   ;;  %s1257_s20 = smov 3  ;;  %s1237_s3 = smov 12 }
  0x6a   :  { %v2372_v35 = vld [vmem:[%s4662_s0 + $0x10c] ss:$16 sm:%s1109_s25]   ;;  %v1107_v36 = vsel %vm190_vm1, %v2371_v33, %v1102_v34  ;;  %v2379_v44 = vld [vmem:[%s4662_s0 + $0x84] ss:$16 sm:%s1142_s8]   ;;  %s1214_s25 = smov 12  ;;  %v1181_v45 = vsel %vm195_vm2, %v2387_v42, %v1176_v43  ;;  %s1453_s8 = smov 192 }
  0x6b   :  { %v1112_v39 = vsel %vm195_vm2, %v2372_v35, %v1107_v36  ;;  %v2380_v46 = vld [vmem:[%s4662_s0 + $0x84] ss:$16 sm:%s1145_s14]   ;;  %v2394_v51 = vld [vmem:[%s4662_s0 + $0x8c] ss:$16 sm:%s1211_s24]   ;;  %s1379_s24 = smov 48  ;;  %s1672_s14 = smov 12 }
  0x6c   :  { %1113 = vrot.lane.b32.xlu0 %v1112_v39, %s2596_s15  ;;  %v2381_v47 = vld [vmem:[%s4662_s0 + $0x84] ss:$16 sm:%s1150_s16]   ;;  %1182 = vrot.lane.b32.xlu1 %v1181_v45, %s2596_s15  ;;  %v1148_v48 = vsel %vm185_vm0, %v2380_v46, %v2379_v44  ;;  %s1302_s16 = smov 3 }
  0x6d   :  { %v2382_v49 = vld [vmem:[%s4662_s0 + $0x84] ss:$16 sm:%s1155_s21]   ;;  %v1153_v50 = vsel %vm190_vm1, %v2381_v47, %v1148_v48  ;;  %v2395_v52 = vld [vmem:[%s4662_s0 + $0x8c] ss:$16 sm:%s1214_s25]   ;;  %s1260_s21 = smov 12  ;;  %s1430_s25 = smov 192 }
  0x6e   :  { %v1158_v53 = vsel %vm195_vm2, %v2382_v49, %v1153_v50  ;;  %v1217_v54 = vsel %vm185_vm0, %v2395_v52, %v2394_v51  ;;  %v2396_v55 = vld [vmem:[%s4662_s0 + $0x8c] ss:$16 sm:%s1219_s7]   ;;  %v2389_v58 = vld [vmem:[%s4662_s0 + $0x284] ss:$16 sm:%s1188_s11]   ;;  %s1234_s7 = smov 3  ;;  %s1509_s11 = smov 3 }
  0x6f   :  { %v2397_v56 = vld [vmem:[%s4662_s0 + $0x8c] ss:$16 sm:%s1224_s29]   ;;  %v1222_v57 = vsel %vm190_vm1, %v2396_v55, %v1217_v54  ;;  %v2390_v60 = vld [vmem:[%s4662_s0 + $0x284] ss:$16 sm:%s1191_s9]   ;;  %s1283_s29 = smov 12  ;;  %s1348_s9 = smov 3 }
  0x70   :  { %1159 = vrot.lane.b32.xlu0 %v1158_v53, %s2596_s15  ;;  %v1227_v59 = vsel %vm195_vm2, %v2397_v56, %v1222_v57  ;;  %v2391_v61 = vld [vmem:[%s4662_s0 + $0x284] ss:$16 sm:%s1196_s10]   ;;  %v1194_v62 = vsel %vm185_vm0, %v2390_v60, %v2389_v58  ;;  %s1351_s10 = smov 12 }
  0x71   :  { %1228 = vrot.lane.b32.xlu1 %v1227_v59, %s2596_s15  ;;  %v2392_v63 = vld [vmem:[%s4662_s0 + $0x284] ss:$16 sm:%s1201_s17]   ;;  %v1199_v0 = vsel %vm190_vm1, %v2391_v61, %v1194_v62  ;;  %s1305_s17 = smov 12 }
  0x72   :  { %v2404_v1 = vld [vmem:[%s4662_s0 + $0x28c] ss:$16 sm:%s1257_s20]   ;;  %v1204_v3 = vsel %vm195_vm2, %v2392_v63, %v1199_v0  ;;  %v2413_v16 = vld [vmem:[%s4662_s0 + $0x103] ss:$16 sm:%s1302_s16]   ;;  %s1425_s20 = smov 48  ;;  %s1476_s16 = smov 192 }
  0x73   :  { %v2405_v2 = vld [vmem:[%s4662_s0 + $0x28c] ss:$16 sm:%s1260_s21]   ;;  %v2414_v17 = vld [vmem:[%s4662_s0 + $0x103] ss:$16 sm:%s1305_s17]   ;;  %s1356_s17 = smov 48  ;;  %s1911_s21 = smov 192 }
  0x74   :  { %v1263_v4 = vsel %vm185_vm0, %v2405_v2, %v2404_v1  ;;  %v2406_v5 = vld [vmem:[%s4662_s0 + $0x28c] ss:$16 sm:%s1265_s6]   ;;  %1205 = vrot.lane.b32.xlu0 %v1204_v3, %s2596_s15  ;;  %s1280_s6 = smov 3  ;;  %v1308_v19 = vsel %vm185_vm0, %v2414_v17, %v2413_v16 }
  0x75   :  { %v2407_v6 = vld [vmem:[%s4662_s0 + $0x28c] ss:$16 sm:%s1270_s26]   ;;  %v1268_v7 = vsel %vm190_vm1, %v2406_v5, %v1263_v4  ;;  %v2415_v20 = vld [vmem:[%s4662_s0 + $0x103] ss:$16 sm:%s1310_s22]   ;;  %s1325_s22 = smov 3  ;;  %s1328_s26 = smov 12 }
  0x76   :  { %v2399_v8 = vld [vmem:[%s4662_s0 + $0x18c] ss:$16 sm:%s1234_s7]   ;;  %v1273_v9 = vsel %vm195_vm2, %v2407_v6, %v1268_v7  ;;  %v2416_v21 = vld [vmem:[%s4662_s0 + $0x103] ss:$16 sm:%s1315_s23]   ;;  %v1313_v23 = vsel %vm190_vm1, %v2415_v20, %v1308_v19  ;;  %s1374_s23 = smov 12  ;;  %s1494_s7 = smov 48 }
  0x77   :  { %v2400_v10 = vld [vmem:[%s4662_s0 + $0x18c] ss:$16 sm:%s1237_s3]   ;;  %1274 = vrot.lane.b32.xlu1 %v1273_v9, %s2596_s15  ;;  %v1318_v25 = vsel %vm195_vm2, %v2416_v21, %v1313_v23  ;;  %s1499_s3 = smov 192 }
  0x78   :  { %v2401_v11 = vld [vmem:[%s4662_s0 + $0x18c] ss:$16 sm:%s1242_s4]   ;;  %v1240_v12 = vsel %vm185_vm0, %v2400_v10, %v2399_v8  ;;  %v3375_v14 = vpop.permute.xlu1 %242   ;;  %v2409_v24 = vld [vmem:[%s4662_s0 + $0x3] ss:$16 sm:%s1280_s6]   ;;  %s1394_s4 = smov 3  ;;  %s1486_s6 = smov 3 }
  0x79   :  { %v2402_v13 = vld [vmem:[%s4662_s0 + $0x18c] ss:$16 sm:%s1247_s12]   ;;  %v1245_v15 = vsel %vm190_vm1, %v2401_v11, %v1240_v12  ;;  %v2410_v26 = vld [vmem:[%s4662_s0 + $0x3] ss:$16 sm:%s1283_s29]   ;;  %s1402_s12 = smov 48  ;;  %s1626_s29 = smov 12 }
  0x7a   :  { %v1250_v18 = vsel %vm195_vm2, %v2402_v13, %v1245_v15  ;;  %v2411_v27 = vld [vmem:[%s4662_s0 + $0x3] ss:$16 sm:%s1288_s30]   ;;  %v1286_v29 = vsel %vm185_vm0, %v2410_v26, %v2409_v24  ;;  %v2423_v32 = vld [vmem:[%s4662_s0 + $0xb] ss:$16 sm:%s1348_s9]   ;;  %s1440_s30 = smov 3  ;;  %s1471_s9 = smov 48 }
  0x7b   :  { %1251 = vrot.lane.b32.xlu0 %v1250_v18, %s2596_s15  ;;  %1319 = vrot.lane.b32.xlu1 %v1318_v25, %s2597_s19  ;;  %v2412_v30 = vld [vmem:[%s4662_s0 + $0x3] ss:$16 sm:%s1293_s5]   ;;  %v1291_v31 = vsel %vm190_vm1, %v2411_v27, %v1286_v29  ;;  %s1397_s5 = smov 12  ;;  %s1448_s15 = smov 48 }
  0x7c   :  { %v3392_v22 = vpop.permute.xlu0 %197   ;;  %v2424_v33 = vld [vmem:[%s4662_s0 + $0xb] ss:$16 sm:%s1351_s10]   ;;  %v1296_v34 = vsel %vm195_vm2, %v2412_v30, %v1291_v31  ;;  %v2418_v40 = vld [vmem:[%s4662_s0 + $0x203] ss:$16 sm:%s1325_s22]   ;;  %s1577_s22 = smov 3  ;;  %s1852_s10 = smov 3 }
  0x7d   :  { %v3406_v28 = vpop.permute.xlu1 %265   ;;  %v1354_v35 = vsel %vm185_vm0, %v2424_v33, %v2423_v32  ;;  %v2425_v36 = vld [vmem:[%s4662_s0 + $0xb] ss:$16 sm:%s1356_s17]   ;;  %v2419_v42 = vld [vmem:[%s4662_s0 + $0x203] ss:$16 sm:%s1328_s26]   ;;  %s1371_s17 = smov 3  ;;  %s1545_s26 = smov 192 }
  0x7e   :  { %v2426_v37 = vld [vmem:[%s4662_s0 + $0xb] ss:$16 sm:%s1361_s18]   ;;  %v1359_v39 = vsel %vm190_vm1, %v2425_v36, %v1354_v35  ;;  %v2420_v43 = vld [vmem:[%s4662_s0 + $0x203] ss:$16 sm:%s1333_s27]   ;;  %v1331_v45 = vsel %vm185_vm0, %v2419_v42, %v2418_v40  ;;  %s1420_s18 = smov 12  ;;  %s1810_s27 = smov 12 }
  0x7f   :  { %1297 = vrot.lane.b32.xlu0 %v1296_v34, %s2597_s19  ;;  %v1364_v41 = vsel %vm195_vm2, %v2426_v37, %v1359_v39  ;;  %v2421_v46 = vld [vmem:[%s4662_s0 + $0x203] ss:$16 sm:%s1338_s2]   ;;  %v1336_v47 = vsel %vm190_vm1, %v2420_v43, %v1331_v45  ;;  %s1443_s2 = smov 12  ;;  %v2125_v27 = vld [vmem:[%s4662_s0 + $0x100] ss:$8 sm:$0xf]  }
  0x80   :  { %v3428_v38 = vpop.permute.xlu0 %219   ;;  %1365 = vrot.lane.b32.xlu1 %v1364_v41, %s2597_s19  ;;  %v2433_v48 = vld [vmem:[%s4662_s0 + $0x20b] ss:$16 sm:%s1394_s4]   ;;  %v1341_v50 = vsel %vm195_vm2, %v2421_v46, %v1336_v47  ;;  %s1463_s4 = smov 3  ;;  %v2126_v35 = vld [vmem:[%s4662_s0 + $0x100] ss:$8 sm:$0xf0]  }
  0x81   :  { %v2434_v49 = vld [vmem:[%s4662_s0 + $0x20b] ss:$16 sm:%s1397_s5]   ;;  %v2443_v0 = vld [vmem:[%s4662_s0 + $0x183] ss:$16 sm:%s1440_s30]   ;;  %v64_v40 = vsel %vm4_vm3, %v2126_v35, %v2125_v27  ;;  %s4281_s5 = smov 3  ;;  %s2039_s30 = smov 12 }
  0x82   :  { %v1400_v51 = vsel %vm185_vm0, %v2434_v49, %v2433_v48  ;;  %v2435_v52 = vld [vmem:[%s4662_s0 + $0x20b] ss:$16 sm:%s1402_s12]   ;;  %s1417_s12 = smov 3  ;;  %v2444_v1 = vld [vmem:[%s4662_s0 + $0x183] ss:$16 sm:%s1443_s2]   ;;  %s2082_s2 = smov 3 }
  0x83   :  { %v3442_v44 = vpop.permute.xlu1 %311   ;;  %v2436_v53 = vld [vmem:[%s4662_s0 + $0x20b] ss:$16 sm:%s1407_s13]   ;;  %1342 = vrot.lane.b32.xlu0 %v1341_v50, %s2597_s19  ;;  %v1405_v55 = vsel %vm190_vm1, %v2435_v52, %v1400_v51  ;;  %v1446_v3 = vsel %vm185_vm0, %v2444_v1, %v2443_v0  ;;  %2127 = vst.msk [vmem:[%s4663_s1 + $0x20] ss:$8 sm:$0x3] %vm6_vm4, %v64_v40   ;;  %s1669_s13 = smov 3 }
  0x84   :  { %v2428_v56 = vld [vmem:[%s4662_s0 + $0x10b] ss:$16 sm:%s1371_s17]   ;;  %v1410_v57 = vsel %vm195_vm2, %v2436_v53, %v1405_v55  ;;  %v2445_v4 = vld [vmem:[%s4662_s0 + $0x183] ss:$16 sm:%s1448_s15]   ;;  %s1532_s17 = smov 3  ;;  %s1517_s15 = smov 48 }
  0x85   :  { %v2429_v58 = vld [vmem:[%s4662_s0 + $0x10b] ss:$16 sm:%s1374_s23]   ;;  %1411 = vrot.lane.b32.xlu1 %v1410_v57, %s2597_s19  ;;  %v1451_v7 = vsel %vm190_vm1, %v2445_v4, %v1446_v3  ;;  %s1535_s23 = smov 12  ;;  %2128 = vst.msk [vmem:[%s4663_s1 + $0x11] ss:$8 sm:$0xc] %vm6_vm4, %v64_v40  }
  0x86   :  { %v2430_v59 = vld [vmem:[%s4662_s0 + $0x10b] ss:$16 sm:%s1379_s24]   ;;  %v1377_v61 = vsel %vm185_vm0, %v2429_v58, %v2428_v56  ;;  %v2446_v5 = vld [vmem:[%s4662_s0 + $0x183] ss:$16 sm:%s1453_s8]   ;;  %s1466_s8 = smov 12  ;;  %s1540_s24 = smov 48 }
  0x87   :  { %v3464_v54 = vpop.permute.xlu0 %288   ;;  %v3478_v60 = vpop.permute.xlu1 %357   ;;  %v2431_v62 = vld [vmem:[%s4662_s0 + $0x10b] ss:$16 sm:%s1384_s28]   ;;  %v1382_v63 = vsel %vm190_vm1, %v2430_v59, %v1377_v61  ;;  %v2438_v8 = vld [vmem:[%s4662_s0 + $0x83] ss:$16 sm:%s1417_s12]   ;;  %s1489_s28 = smov 12  ;;  %v1456_v9 = vsel %vm195_vm2, %v2446_v5, %v1451_v7  ;;  %s1555_s12 = smov 3 }
  0x88   :  { %v1387_v2 = vsel %vm195_vm2, %v2431_v62, %v1382_v63  ;;  %v2439_v10 = vld [vmem:[%s4662_s0 + $0x83] ss:$16 sm:%s1420_s18]   ;;  %v2453_v17 = vld [vmem:[%s4662_s0 + $0x8b] ss:$16 sm:%s1486_s6]   ;;  %s1600_s6 = smov 3  ;;  %s3765_s18 = smov 192 }
  0x89   :  { %1388 = vrot.lane.b32.xlu0 %v1387_v2, %s2597_s19  ;;  %v2440_v11 = vld [vmem:[%s4662_s0 + $0x83] ss:$16 sm:%s1425_s20]   ;;  %1457 = vrot.lane.b32.xlu1 %v1456_v9, %s2597_s19  ;;  %v1423_v13 = vsel %vm185_vm0, %v2439_v10, %v2438_v8  ;;  %s3914_s20 = smov 192 }
  0x8a   :  { %v2441_v15 = vld [vmem:[%s4662_s0 + $0x83] ss:$16 sm:%s1430_s25]   ;;  %v1428_v16 = vsel %vm190_vm1, %v2440_v11, %v1423_v13  ;;  %v2454_v18 = vld [vmem:[%s4662_s0 + $0x8b] ss:$16 sm:%s1489_s28]   ;;  %s3630_s25 = smov 192  ;;  %s2598_s28 = smov 32  }
  0x8b   :  { %v3500_v6 = vpop.permute.xlu0 %334   ;;  %v1433_v19 = vsel %vm195_vm2, %v2441_v15, %v1428_v16  ;;  %v1492_v20 = vsel %vm185_vm0, %v2454_v18, %v2453_v17  ;;  %v2455_v21 = vld [vmem:[%s4662_s0 + $0x8b] ss:$16 sm:%s1494_s7]   ;;  %v2448_v26 = vld [vmem:[%s4662_s0 + $0x283] ss:$16 sm:%s1463_s4]   ;;  %s1623_s7 = smov 3 }
  0x8c   :  { %v3514_v12 = vpop.permute.xlu1 %403   ;;  %v2456_v23 = vld [vmem:[%s4662_s0 + $0x8b] ss:$16 sm:%s1499_s3]   ;;  %v1497_v25 = vsel %vm190_vm1, %v2455_v21, %v1492_v20  ;;  %v2449_v30 = vld [vmem:[%s4662_s0 + $0x283] ss:$16 sm:%s1466_s8]   ;;  %s3553_s3 = smov 12  ;;  %s1682_s8 = smov 192 }
  0x8d   :  { %1434 = vrot.lane.b32.xlu0 %v1433_v19, %s2597_s19  ;;  %v1502_v29 = vsel %vm195_vm2, %v2456_v23, %v1497_v25  ;;  %v2450_v31 = vld [vmem:[%s4662_s0 + $0x283] ss:$16 sm:%s1471_s9]   ;;  %v1469_v33 = vsel %vm185_vm0, %v2449_v30, %v2448_v26  ;;  %2129 = vst.msk [vmem:[%s4663_s1 + $0x2] ss:$8 sm:$0x30] %vm6_vm4, %v64_v40  }
  0x8e   :  { %1503 = vrot.lane.b32.xlu1 %v1502_v29, %s2597_s19  ;;  %v2451_v34 = vld [vmem:[%s4662_s0 + $0x283] ss:$16 sm:%s1476_s16]   ;;  %v1474_v36 = vsel %vm190_vm1, %v2450_v31, %v1469_v33  ;;  %s1522_s16 = smov 192  ;;  %2130 = vst.msk [vmem:[%s4663_s1 - $0xd] ss:$8 sm:$0xc0] %vm6_vm4, %v64_v40  }
  0x8f   :  { %v3536_v24 = vpop.permute.xlu0 %380   ;;  %v2463_v37 = vld [vmem:[%s4662_s0 + $0x28b] ss:$16 sm:%s1532_s17]   ;;  %v1479_v41 = vsel %vm195_vm2, %v2451_v34, %v1474_v36  ;;  %v2131_v49 = vld [vmem:[%s4662_s0 + $0x140] ss:$8 sm:$0xf]   ;;  %s1838_s17 = smov 48 }
  0x90   :  { %v2464_v39 = vld [vmem:[%s4662_s0 + $0x28b] ss:$16 sm:%s1535_s23]   ;;  %s1580_s23 = smov 12  ;;  %v2132_v57 = vld [vmem:[%s4662_s0 + $0x140] ss:$8 sm:$0xf0]  }
  0x91   :  { %v1538_v42 = vsel %vm185_vm0, %v2464_v39, %v2463_v37  ;;  %v2465_v43 = vld [vmem:[%s4662_s0 + $0x28b] ss:$16 sm:%s1540_s24]   ;;  %1480 = vrot.lane.b32.xlu0 %v1479_v41, %s2597_s19  ;;  %v79_v62 = vsel %vm4_vm3, %v2132_v57, %v2131_v49  ;;  %v3_v13 = vld [vmem:[%s4662_s0] ss:$8 sm:$0xf0]   ;;  %s3776_s24 = smov 3 }
  0x92   :  { %v3555_v32 = vpop.permute.xlu1 %449   ;;  %v2466_v45 = vld [vmem:[%s4662_s0 + $0x28b] ss:$16 sm:%s1545_s26]   ;;  %v1543_v47 = vsel %vm190_vm1, %v2465_v43, %v1538_v42  ;;  %v2472_v59 = vld [vmem:[%s4662_s0 + $0x102] ss:$16 sm:%s1577_s22]   ;;  %s1807_s26 = smov 3 }
  0x93   :  { %v2458_v48 = vld [vmem:[%s4662_s0 + $0x18b] ss:$16 sm:%s1509_s11]   ;;  %s1585_s11 = smov 48  ;;  %v1548_v50 = vsel %vm195_vm2, %v2466_v45, %v1543_v47  ;;  %v2473_v61 = vld [vmem:[%s4662_s0 + $0x102] ss:$16 sm:%s1580_s23]   ;;  %s1563_s23 = smov 48 }
  0x94   :  { %v2459_v51 = vld [vmem:[%s4662_s0 + $0x18b] ss:$16 sm:%s3553_s3]   ;;  %1549 = vrot.lane.b32.xlu1 %v1548_v50, %s2597_s19  ;;  %v1583_v0 = vsel %vm185_vm0, %v2473_v61, %v2472_v59  ;;  %2133 = vst.msk [vmem:[%s4663_s1 + $0x24] ss:$8 sm:$0x3] %vm6_vm4, %v79_v62   ;;  %s1613_s3 = smov 192 }
  0x95   :  { %v2460_v52 = vld [vmem:[%s4662_s0 + $0x18b] ss:$16 sm:%s1517_s15]   ;;  %s1590_s15 = smov 192  ;;  %v1515_v55 = vsel %vm185_vm0, %v2459_v51, %v2458_v48  ;;  %v2474_v1 = vld [vmem:[%s4662_s0 + $0x102] ss:$16 sm:%s1585_s11]   ;;  %s2085_s11 = smov 12 }
  0x96   :  { %v3581_v46 = vpop.permute.xlu0 %426   ;;  %v495_v53 = vpop.permute.xlu1 %494   ;;  %v2461_v56 = vld [vmem:[%s4662_s0 + $0x18b] ss:$16 sm:%s1522_s16]   ;;  %s1558_s16 = smov 12  ;;  %v1520_v58 = vsel %vm190_vm1, %v2460_v52, %v1515_v55  ;;  %v2475_v2 = vld [vmem:[%s4662_s0 + $0x102] ss:$16 sm:%s1590_s15]   ;;  %v1588_v4 = vsel %vm190_vm1, %v2474_v1, %v1583_v0  ;;  %s1631_s15 = smov 48 }
  0x97   :  { %v1525_v63 = vsel %vm195_vm2, %v2461_v56, %v1520_v58  ;;  %2134 = vst.msk [vmem:[%s4663_s1 + $0x15] ss:$8 sm:$0xc] %vm6_vm4, %v79_v62   ;;  %2135 = vst.msk [vmem:[%s4663_s1 + $0x6] ss:$8 sm:$0x30] %vm6_vm4, %v79_v62  }
  0x98   :  { %2136 = vst.msk [vmem:[%s4663_s1 - $0x9] ss:$8 sm:$0xc0] %vm6_vm4, %v79_v62   ;;  %1526 = vrot.lane.b32.xlu0 %v1525_v63, %s2597_s19  ;;  %v2468_v5 = vld [vmem:[%s4662_s0 + $0x2] ss:$16 sm:%s1555_s12]   ;;  %s1761_s12 = smov 3 }
  0x99   :  { %2181 = vst.msk [vmem:[%s4663_s1 + $0x20] sm:$0xff] %vm199_vm6, %v3428_v38   ;;  %2196 = vst.msk [vmem:[%s4663_s1 + $0x28] sm:$0xff] %vm199_vm6, %v3464_v54   ;;  %v2_v38 = vld [vmem:[%s4662_s0] ss:$8 sm:$0xf]   ;;  %v1593_v54 = vsel %vm195_vm2, %v2475_v2, %v1588_v4  ;;  %s1921_s19 = smov 3 }
  0x9a   :  { %v3657_v3 = vpop.permute.xlu0 %472   ;;  %v2469_v7 = vld [vmem:[%s4662_s0 + $0x2] ss:$16 sm:%s1558_s16]   ;;  %2240 = vst.msk [vmem:[%s4663_s1 + $0x20] sm:$0xff] %vm474_vm5, %v495_v53   ;;  %1594 = vrot.lane.b32.xlu1 %v1593_v54, %s2598_s28  ;;  %v5_v18 = vsel %vm4_vm3, %v3_v13, %v2_v38  ;;  %s1692_s16 = smov 3 }
  0x9b   :  { %v2470_v8 = vld [vmem:[%s4662_s0 + $0x2] ss:$16 sm:%s1563_s23]   ;;  %s1636_s23 = smov 192  ;;  %v3688_v9 = vpop.permute.xlu1 %540   ;;  %v1561_v10 = vsel %vm185_vm0, %v2469_v7, %v2468_v5  ;;  %v2482_v16 = vld [vmem:[%s4662_s0 + $0xa] ss:$16 sm:%s1623_s7]   ;;  %s1646_s7 = smov 3 }
  0x9c   :  { %v2471_v11 = vld [vmem:[%s4662_s0 + $0x2] ss:$16 sm:%s3630_s25]   ;;  %s1603_s25 = smov 12  ;;  %v1566_v15 = vsel %vm190_vm1, %v2470_v8, %v1561_v10  ;;  %v2483_v17 = vld [vmem:[%s4662_s0 + $0xa] ss:$16 sm:%s1626_s29]   ;;  %s1608_s29 = smov 48 }
  0x9d   :  { %v1571_v19 = vsel %vm195_vm2, %v2471_v11, %v1566_v15  ;;  %v1629_v20 = vsel %vm185_vm0, %v2483_v17, %v2482_v16  ;;  %v2484_v21 = vld [vmem:[%s4662_s0 + $0xa] ss:$16 sm:%s1631_s15]   ;;  %7 = vst.msk [vmem:[%s4663_s1] ss:$8 sm:$0x3] %vm6_vm4, %v5_v18   ;;  %s1993_s15 = smov 12 }
  0x9e   :  { %v2485_v23 = vld [vmem:[%s4662_s0 + $0xa] ss:$16 sm:%s1636_s23]   ;;  %2104 = vst.msk [vmem:[%s4663_s1 - $0xf] ss:$8 sm:$0xc] %vm6_vm4, %v5_v18   ;;  %v3731_v25 = vpop.permute.xlu0 %517   ;;  %1572 = vrot.lane.b32.xlu0 %v1571_v19, %s2598_s28  ;;  %v1634_v26 = vsel %vm190_vm1, %v2484_v21, %v1629_v20  ;;  %s3778_s23 = smov 12 }
  0x9f   :  { %2105 = vst.msk [vmem:[%s4663_s1 - $0x1e] ss:$8 sm:$0x30] %vm6_vm4, %v5_v18   ;;  %2106 = vst.msk [vmem:[%s4663_s1 - $0x2d] ss:$8 sm:$0xc0] %vm6_vm4, %v5_v18   ;;  %v1639_v30 = vsel %vm195_vm2, %v2485_v23, %v1634_v26 }
  0xa0   :  { %v2477_v27 = vld [vmem:[%s4662_s0 + $0x202] ss:$16 sm:%s1600_s6]   ;;  %s1677_s6 = smov 48  ;;  %v2107_v29 = vld [vmem:[%s4662_s0 + $0x40] ss:$8 sm:$0xf]   ;;  %v3748_v34 = vpop.permute.xlu1 %586   ;;  %1640 = vrot.lane.b32.xlu1 %v1639_v30, %s2598_s28 }
  0xa1   :  { %v2478_v31 = vld [vmem:[%s4662_s0 + $0x202] ss:$16 sm:%s1603_s25]   ;;  %v2108_v37 = vld [vmem:[%s4662_s0 + $0x40] ss:$8 sm:$0xf0]   ;;  %s1860_s25 = smov 48 }
  0xa2   :  { %v2479_v33 = vld [vmem:[%s4662_s0 + $0x202] ss:$16 sm:%s1608_s29]   ;;  %v1606_v35 = vsel %vm185_vm0, %v2478_v31, %v2477_v27  ;;  %v2492_v40 = vld [vmem:[%s4662_s0 + $0x20a] ss:$16 sm:%s1669_s13]   ;;  %v19_v42 = vsel %vm4_vm3, %v2108_v37, %v2107_v29  ;;  %s1705_s29 = smov 192  ;;  %s1764_s13 = smov 12 }
  0xa3   :  { %v2480_v36 = vld [vmem:[%s4662_s0 + $0x202] ss:$16 sm:%s1613_s3]   ;;  %s1649_s3 = smov 12  ;;  %v1611_v39 = vsel %vm190_vm1, %v2479_v33, %v1606_v35  ;;  %v2493_v41 = vld [vmem:[%s4662_s0 + $0x20a] ss:$16 sm:%s1672_s14]   ;;  %s1654_s14 = smov 48 }
  0xa4   :  { %v1616_v43 = vsel %vm195_vm2, %v2480_v36, %v1611_v39  ;;  %v1675_v45 = vsel %vm185_vm0, %v2493_v41, %v2492_v40  ;;  %v2494_v47 = vld [vmem:[%s4662_s0 + $0x20a] ss:$16 sm:%s1677_s6]   ;;  %2109 = vst.msk [vmem:[%s4663_s1 + $0x4] ss:$8 sm:$0x3] %vm6_vm4, %v19_v42   ;;  %v564_v49 = vpop.permute.xlu0 %563   ;;  %v3835_v55 = vpop.permute.xlu1 %632   ;;  %s4064_s6 = smov 3 }
  0xa5   :  { %v2495_v48 = vld [vmem:[%s4662_s0 + $0x20a] ss:$16 sm:%s1682_s8]   ;;  %2110 = vst.msk [vmem:[%s4663_s1 - $0xb] ss:$8 sm:$0xc] %vm6_vm4, %v19_v42   ;;  %1617 = vrot.lane.b32.xlu0 %v1616_v43, %s2598_s28  ;;  %v1680_v50 = vsel %vm190_vm1, %v2494_v47, %v1675_v45  ;;  %s1774_s8 = smov 192 }
  0xa6   :  { %2111 = vst.msk [vmem:[%s4663_s1 - $0x1a] ss:$8 sm:$0x30] %vm6_vm4, %v19_v42   ;;  %2112 = vst.msk [vmem:[%s4663_s1 - $0x29] ss:$8 sm:$0xc0] %vm6_vm4, %v19_v42  }
  0xa7   :  { %v2487_v51 = vld [vmem:[%s4662_s0 + $0x10a] ss:$16 sm:%s1646_s7]   ;;  %s1723_s7 = smov 48  ;;  %200 = vst.msk [vmem:[%s4663_s1] sm:$0xff] %vm199_vm6, %v3392_v22   ;;  %2191 = vst.msk [vmem:[%s4663_s1 + $0x8] sm:$0xff] %vm199_vm6, %v3406_v28   ;;  %v1685_v28 = vsel %vm195_vm2, %v2495_v48, %v1680_v50 }
  0xa8   :  { %v2149_v22 = vld [vmem:[%s4662_s0 + $0x200] ss:$8 sm:$0xf]   ;;  %2255 = vst.msk [vmem:[%s4663_s1 + $0x28] sm:$0xff] %vm474_vm5, %v564_v49   ;;  %v2488_v52 = vld [vmem:[%s4662_s0 + $0x10a] ss:$16 sm:%s1649_s3]   ;;  %v3880_v4 = vpop.permute.xlu0 %609  }
  0xa9   :  { %v2489_v53 = vld [vmem:[%s4662_s0 + $0x10a] ss:$16 sm:%s1654_s14]   ;;  %s1728_s14 = smov 192  ;;  %475 = vst.msk [vmem:[%s4663_s1] sm:$0xff] %vm474_vm5, %v3657_v3   ;;  %2250 = vst.msk [vmem:[%s4663_s1 + $0x8] sm:$0xff] %vm474_vm5, %v3688_v9   ;;  %v1652_v56 = vsel %vm185_vm0, %v2488_v52, %v2487_v51  ;;  %v3897_v10 = vpop.permute.xlu1 %678   ;;  %s1784_s3 = smov 3 }
  0xaa   :  { %1686 = vrot.lane.b32.xlu1 %v1685_v28, %s2598_s28  ;;  %v2490_v57 = vld [vmem:[%s4662_s0 + $0x10a] ss:$16 sm:%s3765_s18]   ;;  %s1695_s18 = smov 12  ;;  %v2150_v58 = vld [vmem:[%s4662_s0 + $0x200] ss:$8 sm:$0xf0]   ;;  %v1657_v59 = vsel %vm190_vm1, %v2489_v53, %v1652_v56 }
  0xab   :  { %v2502_v61 = vld [vmem:[%s4662_s0 + $0x182] ss:$16 sm:%s3776_s24]   ;;  %v124_v63 = vsel %vm4_vm3, %v2150_v58, %v2149_v22  ;;  %v1662_v0 = vsel %vm195_vm2, %v2490_v57, %v1657_v59  ;;  %v2155_v54 = vld [vmem:[%s4662_s0 + $0x240] ss:$8 sm:$0xf]   ;;  %s1738_s24 = smov 3 }
  0xac   :  { %v2503_v62 = vld [vmem:[%s4662_s0 + $0x182] ss:$16 sm:%s3778_s23]   ;;  %s1700_s23 = smov 48  ;;  %2151 = vst.msk [vmem:[%s4663_s1 + $0x40] ss:$8 sm:$0x3] %vm6_vm4, %v124_v63   ;;  %1663 = vrot.lane.b32.xlu0 %v1662_v0, %s2598_s28  ;;  %v3941_v27 = vpop.permute.xlu0 %655  }
  0xad   :  { %v1721_v1 = vsel %vm185_vm0, %v2503_v62, %v2502_v61  ;;  %v2504_v2 = vld [vmem:[%s4662_s0 + $0x182] ss:$16 sm:%s1723_s7]   ;;  %2152 = vst.msk [vmem:[%s4663_s1 + $0x31] ss:$8 sm:$0xc] %vm6_vm4, %v124_v63   ;;  %s1888_s7 = smov 192 }
  0xae   :  { %v2505_v3 = vld [vmem:[%s4662_s0 + $0x182] ss:$16 sm:%s1728_s14]   ;;  %2153 = vst.msk [vmem:[%s4663_s1 + $0x22] ss:$8 sm:$0x30] %vm6_vm4, %v124_v63   ;;  %v1726_v5 = vsel %vm190_vm1, %v2504_v2, %v1721_v1  ;;  %s1843_s14 = smov 192 }
  0xaf   :  { %2154 = vst.msk [vmem:[%s4663_s1 + $0x13] ss:$8 sm:$0xc0] %vm6_vm4, %v124_v63   ;;  %v2497_v38 = vld [vmem:[%s4662_s0 + $0x82] ss:$16 sm:%s1692_s16]   ;;  %s1769_s16 = smov 48  ;;  %v1731_v7 = vsel %vm195_vm2, %v2505_v3, %v1726_v5 }
  0xb0   :  { %v2498_v8 = vld [vmem:[%s4662_s0 + $0x82] ss:$16 sm:%s1695_s18]   ;;  %1732 = vrot.lane.b32.xlu1 %v1731_v7, %s2598_s28  ;;  %v2156_v15 = vld [vmem:[%s4662_s0 + $0x240] ss:$8 sm:$0xf0]   ;;  %s1865_s18 = smov 192 }
  0xb1   :  { %v2499_v9 = vld [vmem:[%s4662_s0 + $0x82] ss:$16 sm:%s1700_s23]   ;;  %v1698_v11 = vsel %vm185_vm0, %v2498_v8, %v2497_v38  ;;  %v2512_v17 = vld [vmem:[%s4662_s0 + $0x8a] ss:$16 sm:%s1761_s12]   ;;  %v139_v19 = vsel %vm4_vm3, %v2156_v15, %v2155_v54  ;;  %s1833_s12 = smov 12  ;;  %s2013_s23 = smov 3 }
  0xb2   :  { %v2500_v13 = vld [vmem:[%s4662_s0 + $0x82] ss:$16 sm:%s1705_s29]   ;;  %s1741_s29 = smov 12  ;;  %v1703_v16 = vsel %vm190_vm1, %v2499_v9, %v1698_v11  ;;  %v2513_v18 = vld [vmem:[%s4662_s0 + $0x8a] ss:$16 sm:%s1764_s13]   ;;  %s1746_s13 = smov 48 }
  0xb3   :  { %v1708_v20 = vsel %vm195_vm2, %v2500_v13, %v1703_v16  ;;  %v1767_v21 = vsel %vm185_vm0, %v2513_v18, %v2512_v17  ;;  %v2514_v23 = vld [vmem:[%s4662_s0 + $0x8a] ss:$16 sm:%s1769_s16]   ;;  %2157 = vst.msk [vmem:[%s4663_s1 + $0x44] ss:$8 sm:$0x3] %vm6_vm4, %v139_v19   ;;  %v702_v48 = vpop.permute.xlu0 %701   ;;  %s2599_s16 = smov 16  }
  0xb4   :  { %v2515_v26 = vld [vmem:[%s4662_s0 + $0x8a] ss:$16 sm:%s1774_s8]   ;;  %2158 = vst.msk [vmem:[%s4663_s1 + $0x35] ss:$8 sm:$0xc] %vm6_vm4, %v139_v19   ;;  %1709 = vrot.lane.b32.xlu0 %v1708_v20, %s2598_s28  ;;  %v1772_v29 = vsel %vm190_vm1, %v2514_v23, %v1767_v21  ;;  %s1797_s8 = smov 192 }
  0xb5   :  { %2159 = vst.msk [vmem:[%s4663_s1 + $0x26] ss:$8 sm:$0x30] %vm6_vm4, %v139_v19   ;;  %2160 = vst.msk [vmem:[%s4663_s1 + $0x17] ss:$8 sm:$0xc0] %vm6_vm4, %v139_v19  }
  0xb6   :  { %v2507_v30 = vld [vmem:[%s4662_s0 + $0x282] ss:$16 sm:%s1738_s24]   ;;  %s1815_s24 = smov 48  ;;  %2186 = vst.msk [vmem:[%s4663_s1 + $0x40] sm:$0xff] %vm199_vm6, %v3375_v14   ;;  %2201 = vst.msk [vmem:[%s4663_s1 + $0x48] sm:$0xff] %vm199_vm6, %v3442_v44   ;;  %v1777_v44 = vsel %vm195_vm2, %v2515_v26, %v1772_v29 }
  0xb7   :  { %v2137_v14 = vld [vmem:[%s4662_s0 + $0x180] ss:$8 sm:$0xf]   ;;  %v2508_v31 = vld [vmem:[%s4662_s0 + $0x282] ss:$16 sm:%s1741_s29]   ;;  %2245 = vst.msk [vmem:[%s4663_s1 + $0x40] sm:$0xff] %vm474_vm5, %v3731_v25   ;;  %v3978_v25 = vpop.permute.xlu1 %724   ;;  %v748_v5 = vpop.permute.xlu0 %747  }
  0xb8   :  { %v2509_v33 = vld [vmem:[%s4662_s0 + $0x282] ss:$16 sm:%s1746_s13]   ;;  %s1820_s13 = smov 192  ;;  %2260 = vst.msk [vmem:[%s4663_s1 + $0x48] sm:$0xff] %vm474_vm5, %v3748_v34   ;;  %1778 = vrot.lane.b32.xlu1 %v1777_v44, %s2598_s28  ;;  %v1744_v34 = vsel %vm185_vm0, %v2508_v31, %v2507_v30 }
  0xb9   :  { %v2510_v35 = vld [vmem:[%s4662_s0 + $0x282] ss:$16 sm:%s3914_s20]   ;;  %s1787_s20 = smov 12  ;;  %v2138_v36 = vld [vmem:[%s4662_s0 + $0x180] ss:$8 sm:$0xf0]   ;;  %v1749_v37 = vsel %vm190_vm1, %v2509_v33, %v1744_v34 }
  0xba   :  { %v2522_v39 = vld [vmem:[%s4662_s0 + $0x28a] ss:$16 sm:%s1807_s26]   ;;  %v94_v41 = vsel %vm4_vm3, %v2138_v36, %v2137_v14  ;;  %v1754_v42 = vsel %vm195_vm2, %v2510_v35, %v1749_v37  ;;  %v2143_v51 = vld [vmem:[%s4662_s0 + $0x1c0] ss:$8 sm:$0xf]   ;;  %s1901_s26 = smov 12 }
  0xbb   :  { %v2523_v40 = vld [vmem:[%s4662_s0 + $0x28a] ss:$16 sm:%s1810_s27]   ;;  %s1792_s27 = smov 48  ;;  %2139 = vst.msk [vmem:[%s4663_s1 + $0x30] ss:$8 sm:$0x3] %vm6_vm4, %v94_v41   ;;  %1755 = vrot.lane.b32.xlu0 %v1754_v42, %s2598_s28  ;;  %v770_v53 = vpop.permute.xlu1 %769   ;;  %v793_v26 = vpop.permute.xlu0 %792  }
  0xbc   :  { %v1813_v43 = vsel %vm185_vm0, %v2523_v40, %v2522_v39  ;;  %v2524_v45 = vld [vmem:[%s4662_s0 + $0x28a] ss:$16 sm:%s1815_s24]   ;;  %2140 = vst.msk [vmem:[%s4663_s1 + $0x21] ss:$8 sm:$0xc] %vm6_vm4, %v94_v41  }
  0xbd   :  { %v2525_v47 = vld [vmem:[%s4662_s0 + $0x28a] ss:$16 sm:%s1820_s13]   ;;  %2141 = vst.msk [vmem:[%s4663_s1 + $0x12] ss:$8 sm:$0x30] %vm6_vm4, %v94_v41   ;;  %v1818_v49 = vsel %vm190_vm1, %v2524_v45, %v1813_v43  ;;  %s1929_s13 = smov 48 }
  0xbe   :  { %2142 = vst.msk [vmem:[%s4663_s1 + $0x3] ss:$8 sm:$0xc0] %vm6_vm4, %v94_v41   ;;  %v2517_v50 = vld [vmem:[%s4662_s0 + $0x18a] ss:$16 sm:%s1784_s3]   ;;  %s1855_s3 = smov 12  ;;  %v1823_v22 = vsel %vm195_vm2, %v2525_v47, %v1818_v49 }
  0xbf   :  { %v2518_v28 = vld [vmem:[%s4662_s0 + $0x18a] ss:$16 sm:%s1787_s20]   ;;  %1824 = vrot.lane.b32.xlu1 %v1823_v22, %s2598_s28  ;;  %v2144_v58 = vld [vmem:[%s4662_s0 + $0x1c0] ss:$8 sm:$0xf0]   ;;  %s1947_s20 = smov 12 }
  0xc0   :  { %v2519_v52 = vld [vmem:[%s4662_s0 + $0x18a] ss:$16 sm:%s1792_s27]   ;;  %v1790_v56 = vsel %vm185_vm0, %v2518_v28, %v2517_v50  ;;  %s1830_s27 = smov 3  ;;  %2299 = vst.msk [vmem:[%s4663_s1 + $0x20] sm:$0xff] %vm749_vm7, %v770_v53   ;;  %v109_v63 = vsel %vm4_vm3, %v2144_v58, %v2143_v51  ;;  %750 = vst.msk [vmem:[%s4663_s1] sm:$0xff] %vm749_vm7, %v748_v5  }
  0xc1   :  { %v2520_v57 = vld [vmem:[%s4662_s0 + $0x18a] ss:$16 sm:%s1797_s8]   ;;  %v1795_v59 = vsel %vm190_vm1, %v2519_v52, %v1790_v56  ;;  %v2531_v61 = vld [vmem:[%s4662_s0 + $0x101] ss:$16 sm:%s1852_s10]   ;;  %s1883_s8 = smov 48  ;;  %v839_v49 = vpop.permute.xlu0 %838   ;;  %s2016_s10 = smov 12 }
  0xc2   :  { %v2532_v62 = vld [vmem:[%s4662_s0 + $0x101] ss:$16 sm:%s1855_s3]   ;;  %v1800_v0 = vsel %vm195_vm2, %v2520_v57, %v1795_v59  ;;  %2145 = vst.msk [vmem:[%s4663_s1 + $0x34] ss:$8 sm:$0x3] %vm6_vm4, %v109_v63   ;;  %s1944_s3 = smov 3 }
  0xc3   :  { %v1858_v1 = vsel %vm185_vm0, %v2532_v62, %v2531_v61  ;;  %v2533_v2 = vld [vmem:[%s4662_s0 + $0x101] ss:$16 sm:%s1860_s25]   ;;  %2146 = vst.msk [vmem:[%s4663_s1 + $0x25] ss:$8 sm:$0xc] %vm6_vm4, %v109_v63   ;;  %1801 = vrot.lane.b32.xlu0 %v1800_v0, %s2598_s28  ;;  %s2044_s28 = smov 48 }
  0xc4   :  { %v2534_v3 = vld [vmem:[%s4662_s0 + $0x101] ss:$16 sm:%s1865_s18]   ;;  %2147 = vst.msk [vmem:[%s4663_s1 + $0x16] ss:$8 sm:$0x30] %vm6_vm4, %v109_v63   ;;  %v1863_v38 = vsel %vm190_vm1, %v2533_v2, %v1858_v1  ;;  %s2049_s18 = smov 192 }
  0xc5   :  { %2148 = vst.msk [vmem:[%s4663_s1 + $0x7] ss:$8 sm:$0xc0] %vm6_vm4, %v109_v63   ;;  %v2527_v54 = vld [vmem:[%s4662_s0 + $0x1] ss:$16 sm:%s1830_s27]   ;;  %s1952_s27 = smov 48  ;;  %v885_v1 = vpop.permute.xlu0 %884  }
  0xc6   :  { %2211 = vst.msk [vmem:[%s4663_s1 + $0x30] sm:$0xff] %vm199_vm6, %v3478_v60   ;;  %2226 = vst.msk [vmem:[%s4663_s1 + $0x38] sm:$0xff] %vm199_vm6, %v3581_v46   ;;  %v2113_v60 = vld [vmem:[%s4662_s0 + $0x80] ss:$8 sm:$0xf]   ;;  %v1868_v46 = vsel %vm195_vm2, %v2534_v3, %v1863_v38 }
  0xc7   :  { %v2528_v7 = vld [vmem:[%s4662_s0 + $0x1] ss:$16 sm:%s1833_s12]   ;;  %2270 = vst.msk [vmem:[%s4663_s1 + $0x30] sm:$0xff] %vm474_vm5, %v3835_v55   ;;  %2285 = vst.msk [vmem:[%s4663_s1 + $0x38] sm:$0xff] %vm474_vm5, %v702_v48   ;;  %v816_v55 = vpop.permute.xlu1 %815   ;;  %s2021_s12 = smov 48 }
  0xc8   :  { %v2529_v8 = vld [vmem:[%s4662_s0 + $0x1] ss:$16 sm:%s1838_s17]   ;;  %s1906_s17 = smov 48  ;;  %1869 = vrot.lane.b32.xlu1 %v1868_v46, %s2599_s16  ;;  %v1836_v9 = vsel %vm185_vm0, %v2528_v7, %v2527_v54  ;;  %v2114_v13 = vld [vmem:[%s4662_s0 + $0x80] ss:$8 sm:$0xf0]  }
  0xc9   :  { %v2530_v11 = vld [vmem:[%s4662_s0 + $0x1] ss:$16 sm:%s1843_s14]   ;;  %s1875_s14 = smov 3  ;;  %2309 = vst.msk [vmem:[%s4663_s1 + $0x8] sm:$0xff] %vm749_vm7, %v816_v55   ;;  %v1841_v15 = vsel %vm190_vm1, %v2529_v8, %v1836_v9  ;;  %v34_v18 = vsel %vm4_vm3, %v2114_v13, %v2113_v60  ;;  %2304 = vst.msk [vmem:[%s4663_s1 + $0x40] sm:$0xff] %vm749_vm7, %v793_v26   ;;  %v931_v9 = vpop.permute.xlu0 %930  }
  0xca   :  { %v2541_v16 = vld [vmem:[%s4662_s0 + $0x9] ss:$16 sm:%s4064_s6]   ;;  %v1846_v19 = vsel %vm195_vm2, %v2530_v11, %v1841_v15  ;;  %2115 = vst.msk [vmem:[%s4663_s1 + $0x10] ss:$8 sm:$0x3] %vm6_vm4, %v34_v18   ;;  %s1934_s6 = smov 192 }
  0xcb   :  { %v2542_v17 = vld [vmem:[%s4662_s0 + $0x9] ss:$16 sm:%s1901_s26]   ;;  %s1878_s26 = smov 12  ;;  %2116 = vst.msk [vmem:[%s4663_s1 + $0x1] ss:$8 sm:$0xc] %vm6_vm4, %v34_v18   ;;  %1847 = vrot.lane.b32.xlu0 %v1846_v19, %s2599_s16  ;;  %v862_v34 = vpop.permute.xlu1 %861  }
  0xcc   :  { %v1904_v20 = vsel %vm185_vm0, %v2542_v17, %v2541_v16  ;;  %v2543_v21 = vld [vmem:[%s4662_s0 + $0x9] ss:$16 sm:%s1906_s17]   ;;  %2117 = vst.msk [vmem:[%s4663_s1 - $0xe] ss:$8 sm:$0x30] %vm6_vm4, %v34_v18  }
  0xcd   :  { %v2544_v23 = vld [vmem:[%s4662_s0 + $0x9] ss:$16 sm:%s1911_s21]   ;;  %2118 = vst.msk [vmem:[%s4663_s1 - $0x1d] ss:$8 sm:$0xc0] %vm6_vm4, %v34_v18   ;;  %v1909_v29 = vsel %vm190_vm1, %v2543_v21, %v1904_v20  ;;  %s1924_s21 = smov 12 }
  0xce   :  { %v2536_v30 = vld [vmem:[%s4662_s0 + $0x201] ss:$16 sm:%s1875_s14]   ;;  %v2119_v14 = vld [vmem:[%s4662_s0 + $0xc0] ss:$8 sm:$0xf]   ;;  %v1914_v44 = vsel %vm195_vm2, %v2544_v23, %v1909_v29  ;;  %2319 = vst.msk [vmem:[%s4663_s1 + $0x48] sm:$0xff] %vm749_vm7, %v862_v34  }
  0xcf   :  { %v2537_v31 = vld [vmem:[%s4662_s0 + $0x201] ss:$16 sm:%s1878_s26]   ;;  %s1957_s26 = smov 192  ;;  %1915 = vrot.lane.b32.xlu1 %v1914_v44, %s2599_s16  ;;  %v2120_v37 = vld [vmem:[%s4662_s0 + $0xc0] ss:$8 sm:$0xf0]  }
  0xd0   :  { %v2538_v33 = vld [vmem:[%s4662_s0 + $0x201] ss:$16 sm:%s1883_s8]   ;;  %v1881_v35 = vsel %vm185_vm0, %v2537_v31, %v2536_v30  ;;  %v49_v40 = vsel %vm4_vm3, %v2120_v37, %v2119_v14  ;;  %v2551_v41 = vld [vmem:[%s4662_s0 + $0x209] ss:$16 sm:%s1944_s3]   ;;  %s4269_s14 = smov 48  ;;  %s2026_s3 = smov 192  ;;  %v977_v31 = vpop.permute.xlu0 %976  }
  0xd1   :  { %v2539_v36 = vld [vmem:[%s4662_s0 + $0x201] ss:$16 sm:%s1888_s7]   ;;  %v1886_v39 = vsel %vm190_vm1, %v2538_v33, %v1881_v35  ;;  %v2552_v42 = vld [vmem:[%s4662_s0 + $0x209] ss:$16 sm:%s1947_s20]   ;;  %s4271_s20 = smov 192 }
  0xd2   :  { %v1891_v43 = vsel %vm195_vm2, %v2539_v36, %v1886_v39  ;;  %2121 = vst.msk [vmem:[%s4663_s1 + $0x14] ss:$8 sm:$0x3] %vm6_vm4, %v49_v40   ;;  %2122 = vst.msk [vmem:[%s4663_s1 + $0x5] ss:$8 sm:$0xc] %vm6_vm4, %v49_v40   ;;  %v1950_v45 = vsel %vm185_vm0, %v2552_v42, %v2551_v41 }
  0xd3   :  { %2123 = vst.msk [vmem:[%s4663_s1 - $0xa] ss:$8 sm:$0x30] %vm6_vm4, %v49_v40   ;;  %2124 = vst.msk [vmem:[%s4663_s1 - $0x19] ss:$8 sm:$0xc0] %vm6_vm4, %v49_v40   ;;  %1892 = vrot.lane.b32.xlu0 %v1891_v43, %s2599_s16 }
  0xd4   :  { %v2553_v47 = vld [vmem:[%s4662_s0 + $0x209] ss:$16 sm:%s1952_s27]   ;;  %s4228_s27 = smov 3  ;;  %2206 = vst.msk [vmem:[%s4663_s1 + $0x10] sm:$0xff] %vm199_vm6, %v3500_v6   ;;  %2221 = vst.msk [vmem:[%s4663_s1 + $0x18] sm:$0xff] %vm199_vm6, %v3514_v12  }
  0xd5   :  { %v2554_v48 = vld [vmem:[%s4662_s0 + $0x209] ss:$16 sm:%s1957_s26]   ;;  %v1955_v6 = vsel %vm190_vm1, %v2553_v47, %v1950_v45  ;;  %v2161_v50 = vld [vmem:[%s4662_s0 + $0x280] ss:$8 sm:$0xf]   ;;  %2314 = vst.msk [vmem:[%s4663_s1 + $0x28] sm:$0xff] %vm749_vm7, %v839_v49   ;;  %v1023_v49 = vpop.permute.xlu0 %1022  }
  0xd6   :  { %v2546_v12 = vld [vmem:[%s4662_s0 + $0x109] ss:$16 sm:%s1921_s19]   ;;  %2265 = vst.msk [vmem:[%s4663_s1 + $0x10] sm:$0xff] %vm474_vm5, %v3880_v4   ;;  %v1960_v4 = vsel %vm195_vm2, %v2554_v48, %v1955_v6  ;;  %2280 = vst.msk [vmem:[%s4663_s1 + $0x18] sm:$0xff] %vm474_vm5, %v3897_v10   ;;  %v908_v10 = vpop.permute.xlu1 %907  }
  0xd7   :  { %v2547_v51 = vld [vmem:[%s4662_s0 + $0x109] ss:$16 sm:%s1924_s21]   ;;  %1961 = vrot.lane.b32.xlu1 %v1960_v4, %s2599_s16  ;;  %v2162_v53 = vld [vmem:[%s4662_s0 + $0x280] ss:$8 sm:$0xf0]  }
  0xd8   :  { %v2548_v22 = vld [vmem:[%s4662_s0 + $0x109] ss:$16 sm:%s1929_s13]   ;;  %v1927_v28 = vsel %vm185_vm0, %v2547_v51, %v2546_v12  ;;  %2329 = vst.msk [vmem:[%s4663_s1 + $0x30] sm:$0xff] %vm749_vm7, %v908_v10   ;;  %v154_v57 = vsel %vm4_vm3, %v2162_v53, %v2161_v50  ;;  %v2167_v58 = vld [vmem:[%s4662_s0 + $0x2c0] ss:$8 sm:$0xf]  }
  0xd9   :  { %v2549_v52 = vld [vmem:[%s4662_s0 + $0x109] ss:$16 sm:%s1934_s6]   ;;  %v1932_v56 = vsel %vm190_vm1, %v2548_v22, %v1927_v28  ;;  %v2168_v59 = vld [vmem:[%s4662_s0 + $0x2c0] ss:$8 sm:$0xf0]   ;;  %s1975_s13 = smov 48  ;;  %v1068_v50 = vpop.permute.xlu0 %1067  }
  0xda   :  { %v1937_v61 = vsel %vm195_vm2, %v2549_v52, %v1932_v56  ;;  %2163 = vst.msk [vmem:[%s4663_s1 + $0x50] ss:$8 sm:$0x3] %vm6_vm4, %v154_v57   ;;  %2164 = vst.msk [vmem:[%s4663_s1 + $0x41] ss:$8 sm:$0xc] %vm6_vm4, %v154_v57   ;;  %v169_v62 = vsel %vm4_vm3, %v2168_v59, %v2167_v58  ;;  %v954_v38 = vpop.permute.xlu1 %953  }
  0xdb   :  { %2165 = vst.msk [vmem:[%s4663_s1 + $0x32] ss:$8 sm:$0x30] %vm6_vm4, %v154_v57   ;;  %2166 = vst.msk [vmem:[%s4663_s1 + $0x23] ss:$8 sm:$0xc0] %vm6_vm4, %v154_v57   ;;  %1938 = vrot.lane.b32.xlu0 %v1937_v61, %s2599_s16 }
  0xdc   :  { %v2561_v63 = vld [vmem:[%s4662_s0 + $0x181] ss:$16 sm:%s4228_s27]   ;;  %2169 = vst.msk [vmem:[%s4663_s1 + $0x54] ss:$8 sm:$0x3] %vm6_vm4, %v169_v62  }
  0xdd   :  { %v2562_v0 = vld [vmem:[%s4662_s0 + $0x181] ss:$16 sm:%s1993_s15]   ;;  %s1970_s15 = smov 12  ;;  %2170 = vst.msk [vmem:[%s4663_s1 + $0x45] ss:$8 sm:$0xc] %vm6_vm4, %v169_v62  }
  0xde   :  { %2171 = vst.msk [vmem:[%s4663_s1 + $0x36] ss:$8 sm:$0x30] %vm6_vm4, %v169_v62   ;;  %2172 = vst.msk [vmem:[%s4663_s1 + $0x27] ss:$8 sm:$0xc0] %vm6_vm4, %v169_v62   ;;  %v1996_v2 = vsel %vm185_vm0, %v2562_v0, %v2561_v63  ;;  %v1000_v19 = vpop.permute.xlu1 %999   ;;  %v1114_v51 = vpop.permute.xlu0 %1113  }
  0xdf   :  { %v2563_v3 = vld [vmem:[%s4662_s0 + $0x181] ss:$16 sm:%s4269_s14]   ;;  %s1980_s14 = smov 192  ;;  %2324 = vst.msk [vmem:[%s4663_s1 + $0x10] sm:$0xff] %vm749_vm7, %v885_v1   ;;  %2339 = vst.msk [vmem:[%s4663_s1 + $0x18] sm:$0xff] %vm749_vm7, %v954_v38  }
  0xe0   :  { %2216 = vst.msk [vmem:[%s4663_s1 + $0x50] sm:$0xff] %vm199_vm6, %v3536_v24   ;;  %2231 = vst.msk [vmem:[%s4663_s1 + $0x58] sm:$0xff] %vm199_vm6, %v3555_v32   ;;  %v2001_v24 = vsel %vm190_vm1, %v2563_v3, %v1996_v2  ;;  %v2564_v32 = vld [vmem:[%s4662_s0 + $0x181] ss:$16 sm:%s4271_s20]  }
  0xe1   :  { %v2556_v5 = vld [vmem:[%s4662_s0 + $0x81] ss:$16 sm:%s4281_s5]   ;;  %s2036_s5 = smov 3  ;;  %2275 = vst.msk [vmem:[%s4663_s1 + $0x50] sm:$0xff] %vm474_vm5, %v3941_v27   ;;  %v2006_v27 = vsel %vm195_vm2, %v2564_v32, %v2001_v24  ;;  %2290 = vst.msk [vmem:[%s4663_s1 + $0x58] sm:$0xff] %vm474_vm5, %v3978_v25  }
  0xe2   :  { %v2557_v54 = vld [vmem:[%s4662_s0 + $0x81] ss:$16 sm:%s1970_s15]   ;;  %2007 = vrot.lane.b32.xlu1 %v2006_v27, %s2599_s16  ;;  %2334 = vst.msk [vmem:[%s4663_s1 + $0x50] sm:$0xff] %vm749_vm7, %v931_v9   ;;  %v1045_v40 = vpop.permute.xlu1 %1044   ;;  %v1160_v10 = vpop.permute.xlu0 %1159  }
  0xe3   :  { %v2558_v60 = vld [vmem:[%s4662_s0 + $0x81] ss:$16 sm:%s1975_s13]   ;;  %v1973_v25 = vsel %vm185_vm0, %v2557_v54, %v2556_v5  ;;  %v2571_v8 = vld [vmem:[%s4662_s0 + $0x89] ss:$16 sm:%s2036_s5]  }
  0xe4   :  { %v2559_v46 = vld [vmem:[%s4662_s0 + $0x81] ss:$16 sm:%s1980_s14]   ;;  %v1978_v7 = vsel %vm190_vm1, %v2558_v60, %v1973_v25  ;;  %v2572_v55 = vld [vmem:[%s4662_s0 + $0x89] ss:$16 sm:%s2039_s30]  }
  0xe5   :  { %v1983_v11 = vsel %vm195_vm2, %v2559_v46, %v1978_v7  ;;  %v2042_v13 = vsel %vm185_vm0, %v2572_v55, %v2571_v8  ;;  %v2573_v15 = vld [vmem:[%s4662_s0 + $0x89] ss:$16 sm:%s2044_s28]   ;;  %v2566_v18 = vld [vmem:[%s4662_s0 + $0x281] ss:$16 sm:%s2013_s23]   ;;  %s2090_s28 = smov 48  ;;  %s2059_s23 = smov 3 }
  0xe6   :  { %v2574_v16 = vld [vmem:[%s4662_s0 + $0x89] ss:$16 sm:%s2049_s18]   ;;  %1984 = vrot.lane.b32.xlu0 %v1983_v11, %s2599_s16  ;;  %v2047_v17 = vsel %vm190_vm1, %v2573_v15, %v2042_v13  ;;  %s2095_s18 = smov 192  ;;  %2349 = vst.msk [vmem:[%s4663_s1 + $0x58] sm:$0xff] %vm749_vm7, %v1000_v19   ;;  %v1091_v12 = vpop.permute.xlu1 %1090   ;;  %v1206_v52 = vpop.permute.xlu0 %1205  }
  0xe7   :  { %v2052_v20 = vsel %vm195_vm2, %v2574_v16, %v2047_v17  ;;  %v2567_v21 = vld [vmem:[%s4662_s0 + $0x281] ss:$16 sm:%s2016_s10]   ;;  %v2581_v14 = vld [vmem:[%s4662_s0 + $0x289] ss:$16 sm:%s2082_s2]   ;;  %s2062_s10 = smov 12 }
  0xe8   :  { %v2568_v23 = vld [vmem:[%s4662_s0 + $0x281] ss:$16 sm:%s2021_s12]   ;;  %2053 = vrot.lane.b32.xlu1 %v2052_v20, %s2599_s16  ;;  %v2019_v26 = vsel %vm185_vm0, %v2567_v21, %v2566_v18  ;;  %s2067_s12 = smov 48  ;;  %2344 = vst.msk [vmem:[%s4663_s1 + $0x38] sm:$0xff] %vm749_vm7, %v977_v31  }
  0xe9   :  { %v2569_v29 = vld [vmem:[%s4662_s0 + $0x281] ss:$16 sm:%s2026_s3]   ;;  %v2024_v30 = vsel %vm190_vm1, %v2568_v23, %v2019_v26  ;;  %v2582_v44 = vld [vmem:[%s4662_s0 + $0x289] ss:$16 sm:%s2085_s11]   ;;  %s2072_s3 = smov 192 }
  0xea   :  { %v2029_v33 = vsel %vm195_vm2, %v2569_v29, %v2024_v30  ;;  %v2088_v34 = vsel %vm185_vm0, %v2582_v44, %v2581_v14  ;;  %v2583_v35 = vld [vmem:[%s4662_s0 + $0x289] ss:$16 sm:%s2090_s28]   ;;  %2358 = vst.msk [vmem:[%s4663_s1 + $0x20] sm:$0xff] %vm1024_vm8, %v1045_v40   ;;  %1025 = vst.msk [vmem:[%s4663_s1] sm:$0xff] %vm1024_vm8, %v1023_v49   ;;  %v1137_v4 = vpop.permute.xlu1 %1136  }
  0xeb   :  { %v2584_v36 = vld [vmem:[%s4662_s0 + $0x289] ss:$16 sm:%s2095_s18]   ;;  %2030 = vrot.lane.b32.xlu0 %v2029_v33, %s2599_s16  ;;  %v2093_v37 = vsel %vm190_vm1, %v2583_v35, %v2088_v34  ;;  %2368 = vst.msk [vmem:[%s4663_s1 + $0x8] sm:$0xff] %vm1024_vm8, %v1091_v12  }
  0xec   :  { %v2576_v39 = vld [vmem:[%s4662_s0 + $0x189] ss:$16 sm:%s2059_s23]   ;;  %v2098_v41 = vsel %vm195_vm2, %v2584_v36, %v2093_v37  ;;  %2363 = vst.msk [vmem:[%s4663_s1 + $0x40] sm:$0xff] %vm1024_vm8, %v1068_v50   ;;  %2378 = vst.msk [vmem:[%s4663_s1 + $0x48] sm:$0xff] %vm1024_vm8, %v1137_v4  }
  0xed   :  { %v2577_v42 = vld [vmem:[%s4662_s0 + $0x189] ss:$16 sm:%s2062_s10]   ;;  %2099 = vrot.lane.b32.xlu1 %v2098_v41, %s2599_s16  ;;  %2373 = vst.msk [vmem:[%s4663_s1 + $0x28] sm:$0xff] %vm1024_vm8, %v1114_v51   ;;  %v1252_v56 = vpop.permute.xlu0 %1251  }
  0xee   :  { %v2578_v43 = vld [vmem:[%s4662_s0 + $0x189] ss:$16 sm:%s2067_s12]   ;;  %v2065_v45 = vsel %vm185_vm0, %v2577_v42, %v2576_v39  ;;  %v1183_v22 = vpop.permute.xlu1 %1182   ;;  %2383 = vst.msk [vmem:[%s4663_s1 + $0x10] sm:$0xff] %vm1024_vm8, %v1160_v10   ;;  %2393 = vst.msk [vmem:[%s4663_s1 + $0x50] sm:$0xff] %vm1024_vm8, %v1206_v52  }
  0xef   :  { %v2579_v47 = vld [vmem:[%s4662_s0 + $0x189] ss:$16 sm:%s2072_s3]   ;;  %v2070_v48 = vsel %vm190_vm1, %v2578_v43, %v2065_v45  ;;  %2388 = vst.msk [vmem:[%s4663_s1 + $0x30] sm:$0xff] %vm1024_vm8, %v1183_v22   ;;  %2403 = vst.msk [vmem:[%s4663_s1 + $0x38] sm:$0xff] %vm1024_vm8, %v1252_v56  }
  0xf0   :  { %v2075_v6 = vsel %vm195_vm2, %v2579_v47, %v2070_v48 }
  0xf1   :  { %2076 = vrot.lane.b32.xlu0 %v2075_v6, %s2599_s16  ;;  %v1298_v58 = vpop.permute.xlu0 %1297  }
  0xf2   :  { %v1229_v28 = vpop.permute.xlu1 %1228   ;;  %1300 = vst.msk [vmem:[%s4663_s1] sm:$0xff] %vm1299_vm9, %v1298_v58  }
  0xf3   :  { %2398 = vst.msk [vmem:[%s4663_s1 + $0x18] sm:$0xff] %vm1024_vm8, %v1229_v28  }
  0xf5   :  { %v1343_v61 = vpop.permute.xlu0 %1342  }
  0xf6   :  { %v1275_v53 = vpop.permute.xlu1 %1274   ;;  %2422 = vst.msk [vmem:[%s4663_s1 + $0x40] sm:$0xff] %vm1299_vm9, %v1343_v61  }
  0xf7   :  { %2408 = vst.msk [vmem:[%s4663_s1 + $0x58] sm:$0xff] %vm1024_vm8, %v1275_v53  }
  0xfa   :  { %v1320_v57 = vpop.permute.xlu1 %1319  }
  0xfb   :  { %2417 = vst.msk [vmem:[%s4663_s1 + $0x20] sm:$0xff] %vm1299_vm9, %v1320_v57   ;;  %v1389_v63 = vpop.permute.xlu0 %1388  }
  0xfc   :  { %2432 = vst.msk [vmem:[%s4663_s1 + $0x28] sm:$0xff] %vm1299_vm9, %v1389_v63  }
  0xfe   :  { %v1366_v59 = vpop.permute.xlu1 %1365  }
  0xff   :  { %2427 = vst.msk [vmem:[%s4663_s1 + $0x8] sm:$0xff] %vm1299_vm9, %v1366_v59   ;;  %v1435_v1 = vpop.permute.xlu0 %1434  }
 0x100   :  { %2442 = vst.msk [vmem:[%s4663_s1 + $0x10] sm:$0xff] %vm1299_vm9, %v1435_v1  }
 0x102   :  { %v1412_v62 = vpop.permute.xlu1 %1411  }
 0x103   :  { %2437 = vst.msk [vmem:[%s4663_s1 + $0x48] sm:$0xff] %vm1299_vm9, %v1412_v62   ;;  %v1481_v3 = vpop.permute.xlu0 %1480  }
 0x104   :  { %2452 = vst.msk [vmem:[%s4663_s1 + $0x50] sm:$0xff] %vm1299_vm9, %v1481_v3  }
 0x106   :  { %v1458_v0 = vpop.permute.xlu1 %1457  }
 0x107   :  { %2447 = vst.msk [vmem:[%s4663_s1 + $0x30] sm:$0xff] %vm1299_vm9, %v1458_v0  }
 0x10a   :  { %v1504_v2 = vpop.permute.xlu1 %1503   ;;  %v1527_v32 = vpop.permute.xlu0 %1526  }
 0x10b   :  { %2457 = vst.msk [vmem:[%s4663_s1 + $0x18] sm:$0xff] %vm1299_vm9, %v1504_v2   ;;  %2462 = vst.msk [vmem:[%s4663_s1 + $0x38] sm:$0xff] %vm1299_vm9, %v1527_v32  }
 0x10e   :  { %v1550_v24 = vpop.permute.xlu1 %1549  }
 0x10f   :  { %2467 = vst.msk [vmem:[%s4663_s1 + $0x58] sm:$0xff] %vm1299_vm9, %v1550_v24  }
 0x110   :  { %v1573_v38 = vpop.permute.xlu0 %1572  }
 0x111   :  { %1575 = vst.msk [vmem:[%s4663_s1] sm:$0xff] %vm1574_vm10, %v1573_v38  }
 0x112   :  { %v1595_v5 = vpop.permute.xlu1 %1594  }
 0x113   :  { %2476 = vst.msk [vmem:[%s4663_s1 + $0x20] sm:$0xff] %vm1574_vm10, %v1595_v5  }
 0x116   :  { %v1641_v27 = vpop.permute.xlu1 %1640  }
 0x117   :  { %2486 = vst.msk [vmem:[%s4663_s1 + $0x8] sm:$0xff] %vm1574_vm10, %v1641_v27   ;;  %v1618_v54 = vpop.permute.xlu0 %1617  }
 0x118   :  { %2481 = vst.msk [vmem:[%s4663_s1 + $0x40] sm:$0xff] %vm1574_vm10, %v1618_v54  }
 0x11c   :  { %v1687_v60 = vpop.permute.xlu1 %1686  }
 0x11d   :  { %2496 = vst.msk [vmem:[%s4663_s1 + $0x48] sm:$0xff] %vm1574_vm10, %v1687_v60  }
 0x11e   :  { %v1664_v25 = vpop.permute.xlu0 %1663  }
 0x11f   :  { %2491 = vst.msk [vmem:[%s4663_s1 + $0x28] sm:$0xff] %vm1574_vm10, %v1664_v25  }
 0x122   :  { %v1733_v46 = vpop.permute.xlu1 %1732  }
 0x123   :  { %2506 = vst.msk [vmem:[%s4663_s1 + $0x30] sm:$0xff] %vm1574_vm10, %v1733_v46  }
 0x126   :  { %v1710_v7 = vpop.permute.xlu0 %1709  }
 0x127   :  { %2501 = vst.msk [vmem:[%s4663_s1 + $0x10] sm:$0xff] %vm1574_vm10, %v1710_v7  }
 0x12a   :  { %v1779_v8 = vpop.permute.xlu1 %1778  }
 0x12b   :  { %2516 = vst.msk [vmem:[%s4663_s1 + $0x18] sm:$0xff] %vm1574_vm10, %v1779_v8  }
 0x12d   :  { %v1756_v55 = vpop.permute.xlu0 %1755  }
 0x12e   :  { %2511 = vst.msk [vmem:[%s4663_s1 + $0x50] sm:$0xff] %vm1574_vm10, %v1756_v55  }
 0x131   :  { %v1825_v9 = vpop.permute.xlu1 %1824  }
 0x132   :  { %2526 = vst.msk [vmem:[%s4663_s1 + $0x58] sm:$0xff] %vm1574_vm10, %v1825_v9  }
 0x135   :  { %v1802_v11 = vpop.permute.xlu0 %1801  }
 0x136   :  { %2521 = vst.msk [vmem:[%s4663_s1 + $0x38] sm:$0xff] %vm1574_vm10, %v1802_v11  }
 0x13a   :  { %v1870_v13 = vpop.permute.xlu1 %1869  }
 0x13b   :  { %2535 = vst.msk [vmem:[%s4663_s1 + $0x20] sm:$0xff] %vm1849_vm11, %v1870_v13  }
 0x13d   :  { %v1848_v15 = vpop.permute.xlu0 %1847  }
 0x13e   :  { %1850 = vst.msk [vmem:[%s4663_s1] sm:$0xff] %vm1849_vm11, %v1848_v15  }
 0x141   :  { %v1916_v16 = vpop.permute.xlu1 %1915  }
 0x142   :  { %2545 = vst.msk [vmem:[%s4663_s1 + $0x8] sm:$0xff] %vm1849_vm11, %v1916_v16  }
 0x145   :  { %v1893_v17 = vpop.permute.xlu0 %1892  }
 0x146   :  { %2540 = vst.msk [vmem:[%s4663_s1 + $0x40] sm:$0xff] %vm1849_vm11, %v1893_v17  }
 0x149   :  { %v1962_v18 = vpop.permute.xlu1 %1961  }
 0x14a   :  { %2555 = vst.msk [vmem:[%s4663_s1 + $0x48] sm:$0xff] %vm1849_vm11, %v1962_v18  }
 0x14d   :  { %v1939_v19 = vpop.permute.xlu0 %1938  }
 0x14e   :  { %2550 = vst.msk [vmem:[%s4663_s1 + $0x28] sm:$0xff] %vm1849_vm11, %v1939_v19  }
 0x154   :  { %v2008_v20 = vpop.permute.xlu1 %2007  }
 0x155   :  { %2565 = vst.msk [vmem:[%s4663_s1 + $0x30] sm:$0xff] %vm1849_vm11, %v2008_v20  }
 0x158   :  { %v1985_v21 = vpop.permute.xlu0 %1984  }
 0x159   :  { %2560 = vst.msk [vmem:[%s4663_s1 + $0x10] sm:$0xff] %vm1849_vm11, %v1985_v21  }
 0x15a   :  { %v2054_v23 = vpop.permute.xlu1 %2053  }
 0x15b   :  { %2575 = vst.msk [vmem:[%s4663_s1 + $0x18] sm:$0xff] %vm1849_vm11, %v2054_v23  }
 0x15d   :  { %v2031_v26 = vpop.permute.xlu0 %2030  }
 0x15e   :  { %2570 = vst.msk [vmem:[%s4663_s1 + $0x50] sm:$0xff] %vm1849_vm11, %v2031_v26  }
 0x15f   :  { %v2100_v29 = vpop.permute.xlu1 %2099  }
 0x160   :  { %2585 = vst.msk [vmem:[%s4663_s1 + $0x58] sm:$0xff] %vm1849_vm11, %v2100_v29  }
 0x163   :  { %v2077_v30 = vpop.permute.xlu0 %2076  }
 0x164   :  { %2580 = vst.msk [vmem:[%s4663_s1 + $0x38] sm:$0xff] %vm1849_vm11, %v2077_v30  }

// kernel: tre_forward.1
= control target key start
LH: loop header
LB: loop body
LE: loop exit
PB: predicated region body
PF: predicated region fallthrough
CT: control target
= control target key end

     0   :  { %s962_s18 = smov 0   ;;  %s964_s19 = smov 0   ;;  %s1072_s0 = inlined_call_operand.vmem [shape: f32[3,16,256], index: 0, kind: input, shape index: {}]   ;;  %s1073_s1 = inlined_call_operand.vmem [shape: f32[3,8,256], index: 1, kind: input, shape index: {}]   ;;  %s1074_s2 = inlined_call_operand.vmem [shape: f32[16,8], index: 2, kind: input, shape index: {}]   ;;  %s1075_s3 = inlined_call_operand.vmem [shape: bf16[16,256], index: 3, kind: input, shape index: {}]   ;;  %s1076_s4 = inlined_call_operand.vmem [shape: f32[2,1,128], index: 4, kind: output, shape index: {0}]   ;;  %s1077_s5 = inlined_call_operand.vmem [shape: f32[2,1,128], index: 5, kind: output, shape index: {1}]  }
   0x1   :  { %s966_s20 = smov 0  }
   0x2 LB: > { %s824_s21 = sadd.s32 4294967295, %s930_s20   ;;  %s979_s22 = sadd.s32 1, %s930_s20   ;;  %s930_s20 = sphi %s966_s20, %s1081_s20   ;;  %s926_s19 = sphi %s964_s19, %s1080_s19   ;;  %s922_s18 = sphi %s962_s18, %s1079_s18  }
   0x3   : > { %s20_s23 = ssub.s32 %s930_s20, %s979_s22  ;;  %s23_s24 = sadd.s32 1, %s926_s19 }
   0x4   : > { %p21_p0 = scmp.eq.s32.totalorder %s20_s23, 0  ;;  %p30_p1 = scmp.ne.s32.totalorder %s926_s19, %s922_s18 }
   0x5   : > { %p31_p2 = scmp.eq.s32.totalorder %s930_s20, 0  ;;  %p827_p4 = scmp.ge.s32.totalorder %s930_s20, 2 }
   0x6   : > { %s988_s25 = scalar_select %p21_p0, %s926_s19, %s23_s24  }
   0x7   : > { %p990_p3 = por %p31_p2, %p30_p1  ;;  %184 = sbr.rel (%p827_p4) target bundleno = 35 (0x23), region = 20 }
   0xe   : > { %187 = sbr.rel (!%p990_p3) target bundleno = 21 (0x15), region = 24  ;;  %s189_s27 = sand.u32 (%p990_p3), 1, %s926_s19  }
   0xf   : > { %s828_s28 = sshll.u32 (%p990_p3), %s930_s20, 3  ;;  %s876_s29 = smul.u32 (%p990_p3), 48, %s189_s27 }
  0x10   : > { %s193_s7 = scalar_lea.vmem (%p990_p3), %s1072_s0, %s828_s28 }
  0x11   : > { %v231_v0 = vld [vmem:[%s193_s7] sm:$0xff] (%p990_p3)  ;;  %v233_v1 = vld [vmem:[%s193_s7 + $0x10] sm:$0xff] (%p990_p3)  ;;  %s191_s8 = scalar_lea.vmem (%p990_p3), [#allocation2], %s876_s29 }
  0x12   : > { %v235_v2 = vld [vmem:[%s193_s7 + $0x20] sm:$0xff] (%p990_p3)  ;;  %v237_v3 = vld [vmem:[%s193_s7 + $0x30] sm:$0xff] (%p990_p3)  ;;  %232 = vst [vmem:[%s191_s8] sm:$0xff] (%p990_p3), %v231_v0  ;;  %234 = vst [vmem:[%s191_s8 + $0x8] sm:$0xff] (%p990_p3), %v233_v1 }
  0x13   : > { %v239_v4 = vld [vmem:[%s193_s7 + $0x40] sm:$0xff] (%p990_p3)  ;;  %v241_v5 = vld [vmem:[%s193_s7 + $0x50] sm:$0xff] (%p990_p3)  ;;  %236 = vst [vmem:[%s191_s8 + $0x10] sm:$0xff] (%p990_p3), %v235_v2  ;;  %238 = vst [vmem:[%s191_s8 + $0x18] sm:$0xff] (%p990_p3), %v237_v3 }
  0x14   : > { %240 = vst [vmem:[%s191_s8 + $0x20] sm:$0xff] (%p990_p3), %v239_v4  ;;  %242 = vst [vmem:[%s191_s8 + $0x28] sm:$0xff] (%p990_p3), %v241_v5 }
  0x15 PF: > { %248 = sbr.rel (!%p990_p3) target bundleno = 28 (0x1c), region = 62  ;;  %s250_s9 = sand.u32 (%p990_p3), 1, %s926_s19  }
  0x16   : > { %s829_s10 = sshll.u32 (%p990_p3), %s930_s20, 3  ;;  %s877_s11 = smul.u32 (%p990_p3), 24, %s250_s9 }
  0x17   : > { %s254_s14 = scalar_lea.vmem (%p990_p3), %s1073_s1, %s829_s10 }
  0x18   : > { %v286_v6 = vld [vmem:[%s254_s14] sm:$0xff] (%p990_p3)  ;;  %v288_v7 = vld [vmem:[%s254_s14 + $0x10] sm:$0xff] (%p990_p3)  ;;  %s252_s15 = scalar_lea.vmem (%p990_p3), [#allocation3], %s877_s11 }
  0x19   : > { %v290_v8 = vld [vmem:[%s254_s14 + $0x20] sm:$0xff] (%p990_p3)  ;;  %287 = vst [vmem:[%s252_s15] sm:$0xff] (%p990_p3), %v286_v6  ;;  %289 = vst [vmem:[%s252_s15 + $0x8] sm:$0xff] (%p990_p3), %v288_v7 }
  0x1a   : > { %291 = vst [vmem:[%s252_s15 + $0x10] sm:$0xff] (%p990_p3), %v290_v8 }
  0x1c PF: > { %297 = sbr.rel (!%p990_p3) target bundleno = 35 (0x23), region = 100  ;;  %s299_s16 = sand.u32 (%p990_p3), 1, %s926_s19  }
  0x1d   : > { %s831_s17 = sshll.u32 (%p990_p3), %s930_s20, 2  ;;  %s830_s23 = sshll.u32 (%p990_p3), %s299_s16, 3 }
  0x1e   : > { %s303_s28 = scalar_lea.vmem (%p990_p3), %s1075_s3, %s831_s17  ;;  %s301_s29 = scalar_lea.vmem (%p990_p3), [#allocation4], %s830_s23 }
  0x1f   : > { %v319_v9 = vld [vmem:[%s303_s28] sm:$0xf] (%p990_p3)  ;;  %v321_v10 = vld [vmem:[%s303_s28 + $0x8] sm:$0xf] (%p990_p3) }
  0x20   : > { %320 = vst [vmem:[%s301_s29] sm:$0xf] (%p990_p3), %v319_v9  ;;  %322 = vst [vmem:[%s301_s29 + $0x4] sm:$0xf] (%p990_p3), %v321_v10 }
  0x23 PF: > { %p832_p5 = scmp.ge.s32.totalorder %s930_s20, 1  ;;  %p348_p6 = scmp.lt.s32.totalorder %s930_s20, 3 }
  0x25   : > { %p349_p7 = pnand %p832_p5, %p348_p6 }
  0x26   : > { %s1019_s26 = sand.u32 (!%p349_p7), 1, %s922_s18   ;;  %v411_v11 = vld [vmem:[%s1074_s2] sm:$0xff] (!%p349_p7)  ;;  %vm414_vm0 = vcmask (!%p349_p7), 64512   ;;  %v412_v17 = vld [vmem:[%s1074_s2 + $0x8] sm:$0xff] (!%p349_p7)  ;;  %p405_p8 = scmp.lt.s32.totalorder (!%p349_p7), %s824_s21, 1 }
  0x27   : > { %352 = sbr.rel (%p349_p7) target bundleno = 301 (0x12d), region = 141  ;;  %s833_s7 = sshll.u32 (!%p349_p7), %s1019_s26, 3  ;;  %863 = vmatprep.mubr.msk.f32.mxu0 (!%p349_p7), %vm414_vm0, %v411_v11  ;;  %868 = vmatprep.mubr.msk.f32.mxu1 (!%p349_p7), %vm414_vm0, %v411_v11 }
  0x28   : > { %s879_s8 = smul.u32 (!%p349_p7), 24, %s1019_s26  ;;  %s371_s9 = scalar_lea.vmem (!%p349_p7), [#allocation4], %s833_s7 }
  0x29   : > { %v1028_v12 = vld [vmem:[%s371_s9] sm:$0xff] (!%p349_p7)   ;;  %s878_s15 = smul.u32 (!%p349_p7), 48, %s1019_s26 }
  0x2a   : > { %v850_v13 = vunpack.c.l.bf16 (!%p349_p7), %v1028_v12  ;;  %v851_v14 = vunpack.c.h.bf16 (!%p349_p7), %v1028_v12  ;;  %s364_s18 = scalar_lea.vmem (!%p349_p7), [#allocation3], %s879_s8 }
  0x2b   : > { %v413_v15 = vld [vmem:[%s364_s18] sm:$0xff] (!%p349_p7)  ;;  %v836_v16 = vld [vmem:[%s364_s18 + $0x8] sm:$0xff] (!%p349_p7)  ;;  %v841_v19 = vld [vmem:[%s364_s18 + $0x10] sm:$0xff] (!%p349_p7)  ;;  %s357_s16 = scalar_lea.vmem (!%p349_p7), [#allocation2], %s878_s15 }
  0x2c   : > { %861 = vmatprep.subr.mxu0 (!%p349_p7), %v413_v15  ;;  %v702_v18 = vadd.f32 (!%p349_p7), %v851_v14, %v850_v13  ;;  %866 = vmatprep.subr.mxu1 (!%p349_p7), %v836_v16  ;;  %v497_v26 = vld [vmem:[%s357_s16 + $0x8] sm:$0xff] (!%p349_p7)  ;;  %v840_v27 = vld [vmem:[%s357_s16 + $0x18] sm:$0xff] (!%p349_p7)  ;;  %v496_v28 = vld [vmem:[%s357_s16] sm:$0xff] (!%p349_p7) }
  0x2d   : > { %862 = vmatpush3.msra.mxu0 (!%p349_p7), %v413_v15  ;;  %867 = vmatpush3.msra.mxu1 (!%p349_p7), %v836_v16  ;;  %v839_v29 = vld [vmem:[%s357_s16 + $0x10] sm:$0xff] (!%p349_p7)  ;;  %v845_v38 = vld [vmem:[%s357_s16 + $0x28] sm:$0xff] (!%p349_p7)  ;;  %v844_v41 = vld [vmem:[%s357_s16 + $0x20] sm:$0xff] (!%p349_p7) }
  0x2e   : > { %v703_v20 = vrot.slane %v702_v18, 4  ;;  %864 = vmatmul.mubr.msk.f32.vlgmr.msra.gmra.mrb[0].mxu0 %vm414_vm0, %v412_v17  ;;  %869 = vmatmul.mubr.msk.f32.vlgmr.msra.gmra.mrb[0].mxu1 %vm414_vm0, %v412_v17  ;;  %s1083_s21 = smov (!%p405_p8, %s824_s21), 1 }
  0x2f   : > { %871 = vmatprep.subr.mxu0 %v841_v19  ;;  %873 = vmatprep.mubr.msk.f32.mxu0 %vm414_vm0, %v411_v11  ;;  %s410_s14 = scalar_lea.vmem %s1077_s5, %s1083_s21  ;;  %s407_s23 = scalar_lea.vmem %s1076_s4, %s1083_s21 }
  0x30   : > { %v704_v21 = vadd.f32 %v703_v20, %v702_v18  ;;  %872 = vmatpush3.msra.mxu0 %v841_v19 }
  0x32   : > { %v705_v22 = vrot.slane %v704_v21, 2  ;;  %874 = vmatmul.mubr.msk.f32.vlgmr.msra.gmra.mrb[2].mxu0 %vm414_vm0, %v412_v17 }
  0x34   : > { %v706_v23 = vadd.f32 %v705_v22, %v704_v21 }
  0x36   : > { %v707_v24 = vrot.slane %v706_v23, 1 }
  0x38   : > { %v708_v25 = vadd.f32 %v707_v24, %v706_v23 }
  0x3a   : > { %709 = vst [vmem:[%s410_s14] sm:$0x1] %v708_v25 }
 0x101   : > { %v865_v30 = vpop.f32.mrb[0].mxu0  ;;  %v870_v31 = vpop.f32.mrb[0].mxu1 }
 0x102   : > { %v499_v32 = vsub.f32 %v497_v26, %v865_v30  ;;  %v583_v33 = vsub.f32 %v840_v27, %v870_v31  ;;  %v487_v34 = vpop.f32.mrb[1].mxu0  ;;  %v570_v35 = vpop.f32.mrb[1].mxu1 }
 0x103   : > { %v498_v36 = vsub.f32 %v496_v28, %v487_v34  ;;  %v582_v37 = vsub.f32 %v839_v29, %v570_v35 }
 0x104   : > { %v501_v39 = vmul.f32 %v499_v32, %v499_v32  ;;  %v585_v40 = vmul.f32 %v583_v33, %v583_v33 }
 0x105   : > { %v500_v42 = vmul.f32 %v498_v36, %v498_v36  ;;  %v584_v43 = vmul.f32 %v582_v37, %v582_v37  ;;  %v875_v44 = vpop.f32.mrb[2].mxu0 }
 0x106   : > { %v587_v45 = vadd.f32 %v585_v40, %v501_v39  ;;  %v669_v46 = vsub.f32 %v845_v38, %v875_v44  ;;  %v656_v47 = vpop.f32.mrb[3].mxu0 }
 0x107   : > { %v586_v48 = vadd.f32 %v584_v43, %v500_v42  ;;  %v668_v49 = vsub.f32 %v844_v41, %v656_v47 }
 0x108   : > { %v671_v50 = vmul.f32 %v669_v46, %v669_v46 }
 0x109   : > { %v670_v51 = vmul.f32 %v668_v49, %v668_v49 }
 0x10a   : > { %v673_v52 = vadd.f32 %v671_v50, %v587_v45 }
 0x10b   : > { %v672_v53 = vadd.f32 %v670_v51, %v586_v48 }
 0x10c   : > { %904 = vrsqrt.f32 %v673_v52  ;;  %vm687_vm1 = vcmp.eq.f32.partialorder %v673_v52, inf  ;;  %v690_v57 = vand.u32 2147483648, %v673_v52  ;;  %vm689_vm2 = vcmp.eq.f32.partialorder %v673_v52, 0.0 }
 0x10d   : > { %906 = vrsqrt.f32 %v672_v53  ;;  %vm680_vm3 = vcmp.eq.f32.partialorder %v672_v53, inf  ;;  %v683_v60 = vand.u32 2147483648, %v672_v53  ;;  %vm682_vm4 = vcmp.eq.f32.partialorder %v672_v53, 0.0 }
 0x116   : > { %v905_v54 = vpop.eup %904 }
 0x117   : > { %v907_v55 = vpop.eup %906  ;;  %v686_v56 = vmul.f32 %v905_v54, %v673_v52 }
 0x118   : > { %v679_v58 = vmul.f32 %v907_v55, %v672_v53 }
 0x119   : > { %v688_v59 = vsel %vm687_vm1, %v673_v52, %v686_v56 }
 0x11a   : > { %v691_v61 = vsel %vm689_vm2, %v690_v57, %v688_v59  ;;  %v681_v62 = vsel %vm680_vm3, %v672_v53, %v679_v58 }
 0x11b   : > { %v693_v63 = vmul.f32 %v851_v14, %v691_v61  ;;  %v684_v0 = vsel %vm682_vm4, %v683_v60, %v681_v62 }
 0x11c   : > { %v692_v1 = vmul.f32 %v850_v13, %v684_v0 }
 0x11e   : > { %v694_v2 = vadd.f32 %v693_v63, %v692_v1 }
 0x120   : > { %v695_v3 = vrot.slane %v694_v2, 4 }
 0x122   : > { %v696_v4 = vadd.f32 %v695_v3, %v694_v2 }
 0x124   : > { %v697_v5 = vrot.slane %v696_v4, 2 }
 0x126   : > { %v698_v6 = vadd.f32 %v697_v5, %v696_v4 }
 0x128   : > { %v699_v7 = vrot.slane %v698_v6, 1 }
 0x12a   : > { %v700_v8 = vadd.f32 %v699_v7, %v698_v6 }
 0x12c   : > { %701 = vst [vmem:[%s407_s23] sm:$0x1] %v700_v8 }
 0x12d PF: > { %p13_p9 = scmp.ge.s32.totalorder %s979_s22, 4   ;;  %s1079_s18 = smov %s926_s19 }
 0x12e   : > { %s1080_s19 = smov %s988_s25  ;;  %s1081_s20 = smov %s979_s22 }
 0x12f   :  { %15 = sbr.rel (!%p13_p9) target bundleno = 2 (0x2), region = 220 }

</bundles_post_ra>
